<compile_context>
chip_gen: v6e
topology: v6e:2x2x1
jax: 0.10.0
libtpu: 0.0.40
codegen_flags: <defaults>
</compile_context>

<pallas_src>
import jax
import jax.numpy as jnp
from jax.experimental import pallas as pl
from jax.experimental.pallas import tpu as pltpu


D = 512        # CLIP feature dim (multi_PHOC fc1 in / fc2 out)
HS = 604       # PHOC dim for non-Kanjur experiments (fc1 out / fc2 in)
HS_PAD = 640   # PHOC dim zero-padded to a multiple of 128 (lane-aligned)
EPS = 1e-12
MAX_TB = 512   # batch tile for large B


def _model_text_kernel(feat_ref, phoc_ref, w1_ref, b1_ref, w2_ref, b2_ref,
                       out_ref):
    """fc2(fc1(feat) * phoc), then L2-normalize along the last dim."""
    feat = feat_ref[...]                                   # (TB, D)      bf16
    phoc = phoc_ref[...].astype(jnp.float32)               # (TB, HS_PAD) f32

    # fc1: bf16 MXU matmul with f32 accumulation.
    h = jnp.dot(feat, w1_ref[...],
                preferred_element_type=jnp.float32)        # (TB, HS_PAD)
    h = (h + b1_ref[...]) * phoc                           # PHOC gating (f32)

    # fc2: bf16 MXU matmul with f32 accumulation.
    o = jnp.dot(h.astype(jnp.bfloat16), w2_ref[...],
                preferred_element_type=jnp.float32)        # (TB, D)
    o = o + b2_ref[...]

    # feat / feat.norm(dim=-1, keepdim=True)  via rsqrt (EUP, free slot).
    inv = jax.lax.rsqrt(jnp.sum(o * o, axis=-1, keepdims=True) + EPS)
    out_ref[...] = (o * inv).astype(out_ref.dtype)


def _prepare_phoc(phoc):
    """bf16 PHOC, padded to the lane-aligned width (single fused XLA pass).

    Callers that store phoc pre-padded (B, HS_PAD) bf16 skip this entirely.
    """
    if phoc.shape[-1] == HS_PAD:
        return phoc.astype(jnp.bfloat16)
    pad = HS_PAD - phoc.shape[-1]
    return jnp.pad(phoc, ((0, 0), (0, pad))).astype(jnp.bfloat16)


def model_forward_text(feat, phoc, kernel_params, out_dtype=jnp.float32):
    """JAX wrapper: batch-gridded pallas_call, weights VMEM-resident."""
    w1, b1, w2, b2 = kernel_params          # padded; w1/w2 bf16, b1/b2 f32
    B = feat.shape[0]

    feat = feat.astype(jnp.bfloat16)        # consumed only by the bf16 MXU
    phoc = _prepare_phoc(phoc)

    # Batch tiling: single full-batch block for small B; 512-row tiles
    # (parallel over TensorCores) for large B.  No wrapper-side batch pad —
    # a ragged last tile is handled by Pallas' masked block semantics (rows
    # are independent, so OOB rows never contaminate valid output rows).
    TB = B if B <= MAX_TB else MAX_TB
    grid = (pl.cdiv(B, TB),)

    out = pl.pallas_call(
        _model_text_kernel,
        out_shape=jax.ShapeDtypeStruct((B, D), out_dtype),
        grid=grid,
        in_specs=[
            pl.BlockSpec((TB, D), lambda i: (i, 0)),        # feat (bf16)
            pl.BlockSpec((TB, HS_PAD), lambda i: (i, 0)),   # phoc (bf16, padded)
            pl.BlockSpec((D, HS_PAD), lambda i: (0, 0)),    # w1 (bf16, resident)
            pl.BlockSpec((1, HS_PAD), lambda i: (0, 0)),    # b1 (f32)
            pl.BlockSpec((HS_PAD, D), lambda i: (0, 0)),    # w2 (bf16, resident)
            pl.BlockSpec((1, D), lambda i: (0, 0)),         # b2 (f32)
        ],
        out_specs=pl.BlockSpec((TB, D), lambda i: (i, 0)),
        compiler_params=pltpu.CompilerParams(
            dimension_semantics=("parallel",)),
    )(feat, phoc, w1, b1, w2, b2)

    return out


def init_params(key):
    """Deterministic init mimicking torch.nn.Linear (uniform +-1/sqrt(fan_in)).

    Returns f32 unpadded params (reference) and bf16/padded params (kernel).
    """
    k1, k2, k3, k4 = jax.random.split(key, 4)
    lim1 = 1.0 / jnp.sqrt(jnp.float32(D))
    lim2 = 1.0 / jnp.sqrt(jnp.float32(HS))
    # stored already transposed: [in, out]
    w1 = jax.random.uniform(k1, (D, HS), jnp.float32, -lim1, lim1)
    b1 = jax.random.uniform(k2, (1, HS), jnp.float32, -lim1, lim1)
    w2 = jax.random.uniform(k3, (HS, D), jnp.float32, -lim2, lim2)
    b2 = jax.random.uniform(k4, (1, D), jnp.float32, -lim2, lim2)
    ref_params = (w1, b1, w2, b2)

    # Kernel params: zero-pad HS -> HS_PAD (exact), weights in bf16.
    w1_k = jnp.pad(w1, ((0, 0), (0, HS_PAD - HS))).astype(jnp.bfloat16)
    b1_k = jnp.pad(b1, ((0, 0), (0, HS_PAD - HS)))
    w2_k = jnp.pad(w2, ((0, HS_PAD - HS), (0, 0))).astype(jnp.bfloat16)
    b2_k = b2
    kernel_params = (w1_k, b1_k, w2_k, b2_k)
    return ref_params, kernel_params


def reference_forward_text_f32(feat, phoc, ref_params):
    """Pure-JAX f32 reference matching the PyTorch semantics."""
    w1, b1, w2, b2 = ref_params
    h = feat @ w1 + b1
    h = h * phoc
    o = h @ w2 + b2
    return o / jnp.linalg.norm(o, axis=-1, keepdims=True)


def reference_forward_text_bf16(feat, phoc, kernel_params):
    """Pure-JAX reference mirroring the kernel's bf16/padded arithmetic."""
    w1, b1, w2, b2 = kernel_params
    phoc_p = jnp.pad(phoc, ((0, 0), (0, HS_PAD - HS))).astype(jnp.bfloat16)
    h = jnp.dot(feat.astype(jnp.bfloat16), w1,
                preferred_element_type=jnp.float32)
    h = (h + b1) * phoc_p.astype(jnp.float32)
    o = jnp.dot(h.astype(jnp.bfloat16), w2,
                preferred_element_type=jnp.float32) + b2
    return o * jax.lax.rsqrt(jnp.sum(o * o, axis=-1, keepdims=True) + EPS)


if __name__ == "__main__":
    key = jax.random.PRNGKey(0)
    kp, kf, kph = jax.random.split(key, 3)

    ref_params, kernel_params = init_params(kp)

    B = 4
    # "feat" stands in for the CLIP text-encoder output (B, 512)
    feat = jax.random.normal(kf, (B, D), jnp.float32)
    # PHOC attribute vector (B, 604); PHOC is binary-ish, use bernoulli floats
    phoc = jax.random.bernoulli(kph, 0.3, (B, HS)).astype(jnp.float32)

    out = model_forward_text(feat, phoc, kernel_params)
    out = jax.block_until_ready(out)
    assert out.shape == (B, D)
    assert out.dtype == jnp.float32

    # Tight check vs. a reference doing identical bf16 arithmetic.
    ref_bf16 = reference_forward_text_bf16(feat, phoc, kernel_params)
    assert jnp.allclose(out, ref_bf16, atol=2e-3, rtol=2e-3), \
        "mismatch vs bf16-mirrored reference"

    # Loose check vs. the full-f32 PyTorch-equivalent reference.
    ref_f32 = reference_forward_text_f32(feat, phoc, ref_params)
    assert jnp.allclose(out, ref_f32, atol=3e-2, rtol=0), \
        "mismatch vs f32 reference"

    print("KERNEL_OK")
</pallas_src>

<mosaic_0001>
module attributes {stable_mosaic.version = 11 : i64} {
  func.func @_model_text_kernel(%arg0: i32, %arg1: memref<4x512xbf16, #tpu.memory_space<vmem>>, %arg2: memref<4x640xbf16, #tpu.memory_space<vmem>>, %arg3: memref<512x640xbf16, #tpu.memory_space<vmem>>, %arg4: memref<1x640xf32, #tpu.memory_space<vmem>>, %arg5: memref<640x512xbf16, #tpu.memory_space<vmem>>, %arg6: memref<1x512xf32, #tpu.memory_space<vmem>>, %arg7: memref<4x512xf32, #tpu.memory_space<vmem>>) attributes {dimension_semantics = [#tpu.dimension_semantics<parallel>], iteration_bounds = array<i64: 1>, scalar_prefetch = 0 : i64, scratch_operands = 0 : i64, tpu.core_type = #tpu.core_type<tc>, window_params = [{transform_indices = @transform_0, window_bounds = array<i64: 4, 512>}, {transform_indices = @transform_1, window_bounds = array<i64: 4, 640>}, {pipeline_mode = #tpu.pipeline_mode<synchronous>, transform_indices = @transform_2, window_bounds = array<i64: 512, 640>}, {pipeline_mode = #tpu.pipeline_mode<synchronous>, transform_indices = @transform_3, window_bounds = array<i64: 1, 640>}, {pipeline_mode = #tpu.pipeline_mode<synchronous>, transform_indices = @transform_4, window_bounds = array<i64: 640, 512>}, {pipeline_mode = #tpu.pipeline_mode<synchronous>, transform_indices = @transform_5, window_bounds = array<i64: 1, 512>}, {transform_indices = @transform_6, window_bounds = array<i64: 4, 512>}]} {
    %c0 = arith.constant 0 : index
    %c0_0 = arith.constant 0 : index
    %0 = vector.load %arg1[%c0, %c0_0] : memref<4x512xbf16, #tpu.memory_space<vmem>>, vector<4x512xbf16>
    %c0_1 = arith.constant 0 : index
    %c0_2 = arith.constant 0 : index
    %1 = vector.load %arg2[%c0_1, %c0_2] : memref<4x640xbf16, #tpu.memory_space<vmem>>, vector<4x640xbf16>
    %2 = arith.extf %1 : vector<4x640xbf16> to vector<4x640xf32>
    %c0_3 = arith.constant 0 : index
    %c0_4 = arith.constant 0 : index
    %3 = vector.load %arg3[%c0_3, %c0_4] : memref<512x640xbf16, #tpu.memory_space<vmem>>, vector<512x640xbf16>
    %cst = arith.constant dense<0.000000e+00> : vector<4x640xf32>
    %4 = tpu.matmul %0, %3, %cst {dimension_numbers = #tpu.dot_dimension_numbers<[1], [0], [0], [1], [0, 0, 1, 1], [], []>} : vector<4x512xbf16>, vector<512x640xbf16>, vector<4x640xf32> -> vector<4x640xf32>
    %c0_5 = arith.constant 0 : index
    %c0_6 = arith.constant 0 : index
    %5 = vector.load %arg4[%c0_5, %c0_6] : memref<1x640xf32, #tpu.memory_space<vmem>>, vector<1x640xf32>
    %6 = vector.broadcast %5 : vector<1x640xf32> to vector<4x640xf32>
    %7 = arith.addf %4, %6 : vector<4x640xf32>
    %8 = arith.mulf %7, %2 : vector<4x640xf32>
    %9 = arith.truncf %8 : vector<4x640xf32> to vector<4x640xbf16>
    %c0_7 = arith.constant 0 : index
    %c0_8 = arith.constant 0 : index
    %10 = vector.load %arg5[%c0_7, %c0_8] : memref<640x512xbf16, #tpu.memory_space<vmem>>, vector<640x512xbf16>
    %cst_9 = arith.constant dense<0.000000e+00> : vector<4x512xf32>
    %11 = tpu.matmul %9, %10, %cst_9 {dimension_numbers = #tpu.dot_dimension_numbers<[1], [0], [0], [1], [0, 0, 1, 1], [], []>} : vector<4x640xbf16>, vector<640x512xbf16>, vector<4x512xf32> -> vector<4x512xf32>
    %c0_10 = arith.constant 0 : index
    %c0_11 = arith.constant 0 : index
    %12 = vector.load %arg6[%c0_10, %c0_11] : memref<1x512xf32, #tpu.memory_space<vmem>>, vector<1x512xf32>
    %13 = vector.broadcast %12 : vector<1x512xf32> to vector<4x512xf32>
    %14 = arith.addf %11, %13 : vector<4x512xf32>
    %15 = arith.mulf %14, %14 : vector<4x512xf32>
    %cst_12 = arith.constant dense<0.000000e+00> : vector<4xf32>
    %16 = vector.multi_reduction <add>, %15, %cst_12 [1] : vector<4x512xf32> to vector<4xf32>
    %17 = vector.shape_cast %16 : vector<4xf32> to vector<4x1xf32>
    %cst_13 = arith.constant 9.99999996E-13 : f32
    %18 = vector.broadcast %cst_13 : f32 to vector<4x1xf32>
    %19 = arith.addf %17, %18 : vector<4x1xf32>
    %20 = math.rsqrt %19 : vector<4x1xf32>
    %21 = vector.broadcast %20 : vector<4x1xf32> to vector<4x512xf32>
    %22 = arith.mulf %14, %21 : vector<4x512xf32>
    %c0_14 = arith.constant 0 : index
    %c0_15 = arith.constant 0 : index
    %23 = vector.load %arg7[%c0_14, %c0_15] : memref<4x512xf32, #tpu.memory_space<vmem>>, vector<4x512xf32>
    tpu.vector_store %arg7[%c0_14, %c0_15], %22 {strides = array<i32>} : memref<4x512xf32, #tpu.memory_space<vmem>>, vector<4x512xf32>,
    return
  }
  func.func @transform_0(%arg0: i32) -> (i32, i32) {
    %c0_i32 = arith.constant 0 : i32
    %c0_i32_0 = arith.constant 0 : i32
    return %arg0, %c0_i32 : i32, i32
  }
  func.func @transform_1(%arg0: i32) -> (i32, i32) {
    %c0_i32 = arith.constant 0 : i32
    %c0_i32_0 = arith.constant 0 : i32
    return %arg0, %c0_i32 : i32, i32
  }
  func.func @transform_2(%arg0: i32) -> (i32, i32) {
    %c0_i32 = arith.constant 0 : i32
    %c0_i32_0 = arith.constant 0 : i32
    %c0_i32_1 = arith.constant 0 : i32
    return %c0_i32, %c0_i32_0 : i32, i32
  }
  func.func @transform_3(%arg0: i32) -> (i32, i32) {
    %c0_i32 = arith.constant 0 : i32
    %c0_i32_0 = arith.constant 0 : i32
    %c0_i32_1 = arith.constant 0 : i32
    return %c0_i32, %c0_i32_0 : i32, i32
  }
  func.func @transform_4(%arg0: i32) -> (i32, i32) {
    %c0_i32 = arith.constant 0 : i32
    %c0_i32_0 = arith.constant 0 : i32
    %c0_i32_1 = arith.constant 0 : i32
    return %c0_i32, %c0_i32_0 : i32, i32
  }
  func.func @transform_5(%arg0: i32) -> (i32, i32) {
    %c0_i32 = arith.constant 0 : i32
    %c0_i32_0 = arith.constant 0 : i32
    %c0_i32_1 = arith.constant 0 : i32
    return %c0_i32, %c0_i32_0 : i32, i32
  }
  func.func @transform_6(%arg0: i32) -> (i32, i32) {
    %c0_i32 = arith.constant 0 : i32
    %c0_i32_0 = arith.constant 0 : i32
    return %arg0, %c0_i32 : i32, i32
  }
}

</mosaic_0001>

<bundles_post_ra>
// kernel: tpu_custom_call.1
= control target key start
LH: loop header
LB: loop body
LE: loop exit
PB: predicated region body
PF: predicated region fallthrough
CT: control target
= control target key end

     0   :  { %11 = vsyncpa [#allocation3], 0  ;;  %s3784_s0 = inlined_call_operand.hbm [shape: bf16[4,512], index: 0, kind: input, shape index: {}]   ;;  %s3785_s1 = inlined_call_operand.hbm [shape: bf16[4,640], index: 1, kind: input, shape index: {}]   ;;  %s3786_s2 = inlined_call_operand.hbm [shape: bf16[512,640], index: 2, kind: input, shape index: {}]   ;;  %s3787_s3 = inlined_call_operand.vmem [shape: f32[1,640], index: 3, kind: input, shape index: {}]   ;;  %s3788_s4 = inlined_call_operand.hbm [shape: bf16[640,512], index: 4, kind: input, shape index: {}]   ;;  %s3789_s5 = inlined_call_operand.vmem [shape: f32[1,512], index: 5, kind: input, shape index: {}]   ;;  %s3790_s6 = inlined_call_operand.hbm [shape: f32[4,512], index: 6, kind: output, shape index: {}]  }
   0x1   :  { %12 = vsyncpa [#allocation6], 0 }
   0x2   :  { %13 = vsyncpa [#allocation9], 0 }
   0x3   :  { %14 = vsyncpa [#allocation4], 0  ;;  %s3640_s21 = smov [#allocation5]   ;;  %s3641_s23 = smov [#allocation2]  }
   0x4   :  { %s31_s22 = sshll.u32 %s3640_s21, 4  ;;  %s21_s24 = sshll.u32 %s3641_s23, 4  ;;  %s32_s22 = int_to_ptr.vmem [resolvable:$true] %s31_s22  ;;  %s22_s24 = int_to_ptr.vmem [resolvable:$true] %s21_s24 }
   0x5   :  { %s3540_s25 = scalar_lea.vmem %s32_s22, 160  ;;  %p3545_p1 = scmp.lt.s32.totalorder %s32_s22, %s32_s22 }
   0x6   :  { %p3541_p0 = scmp.ne.s32.totalorder %s32_s22, %s3540_s25  ;;  %p3546_p2 = scmp.lt.s32.totalorder %s3540_s25, %s3540_s25 }
   0x8   :  { %p3547_p3 = por %p3546_p2, %p3545_p1 }
   0xa   :  { %p3548_p4 = pnand %p3547_p3, %p3541_p0 }
   0xc   :  { %3551 = shalt.err (!%p3548_p4)
}
   0xd   :  { %34 = dma.hbm_to_vmem [thread:$0]  %s3785_s1, 160, %s32_s22, [#allocation6]  }
   0xe   :  { %s3560_s28 = scalar_lea.vmem %s22_s24, 128  ;;  %p3565_p6 = scmp.lt.s32.totalorder %s22_s24, %s22_s24 }
   0xf   :  { %p3561_p5 = scmp.ne.s32.totalorder %s22_s24, %s3560_s28  ;;  %p3566_p7 = scmp.lt.s32.totalorder %s3560_s28, %s3560_s28 }
  0x11   :  { %p3567_p8 = por %p3566_p7, %p3565_p6 }
  0x13   :  { %p3568_p9 = pnand %p3567_p8, %p3561_p5 }
  0x15   :  { %3571 = shalt.err (!%p3568_p9)
}
  0x16   :  { %24 = dma.hbm_to_vmem [thread:$0]  %s3784_s0, 128, %s22_s24, [#allocation3]  }
  0x17   :  { %s3642_s7 = smov [#allocation7]  }
  0x18   :  { %s40_s8 = sshll.u32 %s3642_s7, 4  ;;  %s41_s8 = int_to_ptr.vmem [resolvable:$true] %s40_s8 }
  0x19   :  { %s3580_s9 = scalar_lea.vmem %s41_s8, 20480  ;;  %p3585_p11 = scmp.lt.s32.totalorder %s41_s8, %s41_s8 }
  0x1a   :  { %p3581_p10 = scmp.ne.s32.totalorder %s41_s8, %s3580_s9  ;;  %p3586_p12 = scmp.lt.s32.totalorder %s3580_s9, %s3580_s9 }
  0x1c   :  { %p3587_p13 = por %p3586_p12, %p3585_p11 }
  0x1e   :  { %p3588_p0 = pnand %p3587_p13, %p3581_p10 }
  0x20   :  { %3591 = shalt.err (!%p3588_p0)
}
  0x21   :  { %s3643_s1 = smov 320   ;;  %s3644_s10 = smov 20  }
  0x22   :  { %46 = dma.hbm_to_vmem [thread:$0]  %s3786_s2, 20480, %s41_s8, [#allocation6], %s3643_s1, %s3643_s1, %s3644_s10  }
  0x23   :  { %s3645_s13 = smov [#allocation8]  }
  0x24   :  { %s54_s14 = sshll.u32 %s3645_s13, 4  ;;  %s55_s14 = int_to_ptr.vmem [resolvable:$true] %s54_s14 }
  0x25   :  { %s3600_s0 = scalar_lea.vmem %s55_s14, 20480  ;;  %p3605_p2 = scmp.lt.s32.totalorder %s55_s14, %s55_s14 }
  0x26   :  { %p3601_p1 = scmp.ne.s32.totalorder %s55_s14, %s3600_s0  ;;  %p3606_p3 = scmp.lt.s32.totalorder %s3600_s0, %s3600_s0 }
  0x28   :  { %p3607_p4 = por %p3606_p3, %p3605_p2 }
  0x2a   :  { %p3608_p5 = pnand %p3607_p4, %p3601_p1 }
  0x2c   :  { %3611 = shalt.err (!%p3608_p5)
}
  0x2d   :  { %s3646_s15 = smov 256   ;;  %s3647_s16 = smov 16  }
  0x2e   :  { %60 = dma.hbm_to_vmem [thread:$0]  %s3788_s4, 20480, %s55_s14, [#allocation9], %s3646_s15, %s3646_s15, %s3647_s16  }
  0x2f   :  { %3632 = dma.done.wait [#allocation3], 128  }
  0x30   :  { %3633 = vsyncadd [#allocation3], 4294967168 }
  0x31   :  { %3634 = dma.done.wait [#allocation6], 20640  }
  0x32   :  { %3635 = vsyncadd [#allocation6], 4294946656 }
  0x33   :  { %3636 = dma.done.wait [#allocation9], 20480  }
  0x34   :  { %3637 = vsyncadd [#allocation9], 4294946816  ;;  %v3065_v0 = vld [vmem:[#allocation7 + $0x11c] ss:$20 sps:$4 sm:$0xff]   ;;  %v3069_v2 = vld [vmem:[#allocation7 + $0x118] ss:$20 sps:$4 sm:$0xff]   ;;  %v276_v36 = vlaneseq }
  0x35   :  { %v3067_v1 = vld [vmem:[#allocation7 + $0x39c] ss:$20 sps:$4 sm:$0xff]   ;;  %1155 = vmatprep.subr.bf16.mxu0 %v3065_v0  ;;  %v3070_v3 = vld [vmem:[#allocation7 + $0x398] ss:$20 sps:$4 sm:$0xff]   ;;  %v3071_v4 = vld [vmem:[#allocation7 + $0xf4] ss:$20 sps:$4 sm:$0xff]  }
  0x36   :  { %1196 = vmatprep.subr.bf16.mxu1 %v3067_v1  ;;  %1156 = vmatpush1.bf16.msra.mxu0 %v3069_v2  ;;  %v3073_v5 = vld [vmem:[#allocation7 + $0x374] ss:$20 sps:$4 sm:$0xff]   ;;  %v3075_v6 = vld [vmem:[#allocation7 + $0xf0] ss:$20 sps:$4 sm:$0xff]   ;;  %v3077_v8 = vld [vmem:[#allocation7 + $0xcc] ss:$20 sps:$4 sm:$0xff]  }
  0x37   :  { %1197 = vmatpush1.bf16.msra.mxu1 %v3070_v3  ;;  %1157 = vmatprep.subr.bf16.mxu0 %v3071_v4  ;;  %v3076_v7 = vld [vmem:[#allocation7 + $0x370] ss:$20 sps:$4 sm:$0xff]   ;;  %v3079_v9 = vld [vmem:[#allocation7 + $0x34c] ss:$20 sps:$4 sm:$0xff]   ;;  %v3081_v10 = vld [vmem:[#allocation7 + $0xc8] ss:$20 sps:$4 sm:$0xff]  }
  0x38   :  { %1198 = vmatprep.subr.bf16.mxu1 %v3073_v5  ;;  %v3082_v11 = vld [vmem:[#allocation7 + $0x348] ss:$20 sps:$4 sm:$0xff]   ;;  %v3083_v12 = vld [vmem:[#allocation7 + $0xa4] ss:$20 sps:$4 sm:$0xff]   ;;  %v3087_v14 = vld [vmem:[#allocation7 + $0xa0] ss:$20 sps:$4 sm:$0xff]  }
  0x39   :  { %v3085_v13 = vld [vmem:[#allocation7 + $0x324] ss:$20 sps:$4 sm:$0xff]   ;;  %v3088_v15 = vld [vmem:[#allocation7 + $0x320] ss:$20 sps:$4 sm:$0xff]   ;;  %v3089_v16 = vld [vmem:[#allocation7 + $0x7c] ss:$20 sps:$4 sm:$0xff]  }
  0x3a   :  { %1158 = vmatpush1.bf16.msra.mxu0 %v3075_v6  ;;  %v3091_v17 = vld [vmem:[#allocation7 + $0x2fc] ss:$20 sps:$4 sm:$0xff]   ;;  %v3093_v18 = vld [vmem:[#allocation7 + $0x78] ss:$20 sps:$4 sm:$0xff]   ;;  %v3095_v20 = vld [vmem:[#allocation7 + $0x54] ss:$20 sps:$4 sm:$0xff]  }
  0x3b   :  { %1199 = vmatpush1.bf16.msra.mxu1 %v3076_v7  ;;  %1159 = vmatprep.subr.bf16.mxu0 %v3077_v8  ;;  %v3094_v19 = vld [vmem:[#allocation7 + $0x2f8] ss:$20 sps:$4 sm:$0xff]   ;;  %v3097_v21 = vld [vmem:[#allocation7 + $0x2d4] ss:$20 sps:$4 sm:$0xff]   ;;  %v3099_v22 = vld [vmem:[#allocation7 + $0x50] ss:$20 sps:$4 sm:$0xff]  }
  0x3c   :  { %1200 = vmatprep.subr.bf16.mxu1 %v3079_v9  ;;  %v3100_v23 = vld [vmem:[#allocation7 + $0x2d0] ss:$20 sps:$4 sm:$0xff]   ;;  %v3101_v24 = vld [vmem:[#allocation7 + $0x2c] ss:$20 sps:$4 sm:$0xff]   ;;  %v3105_v26 = vld [vmem:[#allocation7 + $0x28] ss:$20 sps:$4 sm:$0xff]  }
  0x3d   :  { %v3103_v25 = vld [vmem:[#allocation7 + $0x2ac] ss:$20 sps:$4 sm:$0xff]   ;;  %v3106_v27 = vld [vmem:[#allocation7 + $0x2a8] ss:$20 sps:$4 sm:$0xff]   ;;  %v3107_v28 = vld [vmem:[#allocation7 + $0x4] ss:$20 sps:$4 sm:$0xff]  }
  0x3e   :  { %1160 = vmatpush1.bf16.msra.mxu0 %v3081_v10  ;;  %v3109_v29 = vld [vmem:[#allocation7 + $0x284] ss:$20 sps:$4 sm:$0xff]   ;;  %v3111_v30 = vld [vmem:[#allocation7] ss:$20 sps:$4 sm:$0xff]   ;;  %v3113_v32 = vld [vmem:[#allocation7 + $0x25c] ss:$20 sps:$4 sm:$0xff]  }
  0x3f   :  { %1201 = vmatpush1.bf16.msra.mxu1 %v3082_v11  ;;  %1161 = vmatprep.subr.bf16.mxu0 %v3083_v12  ;;  %v3112_v31 = vld [vmem:[#allocation7 + $0x280] ss:$20 sps:$4 sm:$0xff]   ;;  %v3115_v33 = vld [vmem:[#allocation7 + $0x4dc] ss:$20 sps:$4 sm:$0xff]   ;;  %v3117_v34 = vld [vmem:[#allocation7 + $0x258] ss:$20 sps:$4 sm:$0xff]  }
  0x40   :  { %1202 = vmatprep.subr.bf16.mxu1 %v3085_v13  ;;  %v3118_v35 = vld [vmem:[#allocation7 + $0x4d8] ss:$20 sps:$4 sm:$0xff]   ;;  %v3648_v37 = vmov 1983009808   ;;  %v3119_v39 = vld [vmem:[#allocation7 + $0x234] ss:$20 sps:$4 sm:$0xff]  }
  0x41   :  { %v304_v38 = vunpack.c.l.s4 %v3648_v37  ;;  %v3121_v40 = vld [vmem:[#allocation7 + $0x4b4] ss:$20 sps:$4 sm:$0xff]   ;;  %v3123_v41 = vld [vmem:[#allocation7 + $0x230] ss:$20 sps:$4 sm:$0xff]   ;;  %v3698_v42 = vshrl.u32 %v276_v36, 7  ;;  %vm2647_vm0 = vcmask 1043456  }
  0x42   :  { %1162 = vmatpush1.bf16.msra.mxu0 %v3087_v14  ;;  %v3124_v44 = vld [vmem:[#allocation7 + $0x4b0] ss:$20 sps:$4 sm:$0xff]   ;;  %v3125_v45 = vld [vmem:[#allocation7 + $0x20c] ss:$20 sps:$4 sm:$0xff]   ;;  %v3129_v47 = vld [vmem:[#allocation7 + $0x208] ss:$20 sps:$4 sm:$0xff]  }
  0x43   :  { %1203 = vmatpush1.bf16.msra.mxu1 %v3088_v15  ;;  %1163 = vmatprep.subr.bf16.mxu0 %v3089_v16  ;;  %v305_v43 = vunpack.c.0.s8 %v304_v38  ;;  %v3127_v46 = vld [vmem:[#allocation7 + $0x48c] ss:$20 sps:$4 sm:$0xff]   ;;  %v3130_v48 = vld [vmem:[#allocation7 + $0x488] ss:$20 sps:$4 sm:$0xff]   ;;  %v3131_v50 = vld [vmem:[#allocation7 + $0x1e4] ss:$20 sps:$4 sm:$0xff]  }
  0x44   :  { %1204 = vmatprep.subr.bf16.mxu1 %v3091_v17  ;;  %v3133_v51 = vld [vmem:[#allocation7 + $0x464] ss:$20 sps:$4 sm:$0xff]   ;;  %v76_v52 = vld [vmem:[#allocation2] sm:$0xff]  ;;  %v3153_v6 = vld [vmem:[#allocation7 + $0x168] ss:$20 sps:$4 sm:$0xff]  }
  0x45   :  { %v308_v49 = vsub.s32 %v305_v43, %v3698_v42  ;;  %v3135_v53 = vld [vmem:[#allocation7 + $0x1e0] ss:$20 sps:$4 sm:$0xff]   ;;  %v302_v55 = vcombine.high %v76_v52, %v76_v52  ;;  %v3137_v57 = vld [vmem:[#allocation7 + $0x1bc] ss:$20 sps:$4 sm:$0xff]   ;;  %v3141_v61 = vld [vmem:[#allocation7 + $0x1b8] ss:$20 sps:$4 sm:$0xff]  }
  0x46   :  { %1164 = vmatpush1.bf16.msra.mxu0 %v3093_v18  ;;  %v3136_v56 = vld [vmem:[#allocation7 + $0x460] ss:$20 sps:$4 sm:$0xff]   ;;  %v3139_v58 = vld [vmem:[#allocation7 + $0x43c] ss:$20 sps:$4 sm:$0xff]   ;;  %v3142_v63 = vld [vmem:[#allocation7 + $0x438] ss:$20 sps:$4 sm:$0xff]  }
  0x47   :  { %1205 = vmatpush1.bf16.msra.mxu1 %v3094_v19  ;;  %1165 = vmatprep.subr.bf16.mxu0 %v3095_v20  ;;  %v3701_v54 = vrot.slane %v76_v52, %v308_v49  ;;  %v3707_v60 = vrot.slane %v302_v55, %v308_v49  ;;  %v3143_v0 = vld [vmem:[#allocation7 + $0x194] ss:$20 sps:$4 sm:$0xff]   ;;  %v3147_v2 = vld [vmem:[#allocation7 + $0x190] ss:$20 sps:$4 sm:$0xff]   ;;  %v3149_v4 = vld [vmem:[#allocation7 + $0x16c] ss:$20 sps:$4 sm:$0xff]  }
  0x48   :  { %1206 = vmatprep.subr.bf16.mxu1 %v3097_v21  ;;  %v3145_v1 = vld [vmem:[#allocation7 + $0x414] ss:$20 sps:$4 sm:$0xff]   ;;  %v3148_v3 = vld [vmem:[#allocation7 + $0x410] ss:$20 sps:$4 sm:$0xff]   ;;  %v3151_v5 = vld [vmem:[#allocation7 + $0x3ec] ss:$20 sps:$4 sm:$0xff]  }
  0x49   :  { %v3705_v59 = vcombine.high %v3701_v54, %v3701_v54  ;;  %v3712_v62 = vcombine.high %v3707_v60, %v3707_v60  ;;  %v3154_v7 = vld [vmem:[#allocation7 + $0x3e8] ss:$20 sps:$4 sm:$0xff]   ;;  %v3155_v8 = vld [vmem:[#allocation7 + $0x144] ss:$20 sps:$4 sm:$0xff]   ;;  %v3159_v10 = vld [vmem:[#allocation7 + $0x140] ss:$20 sps:$4 sm:$0xff]  }
  0x4a   :  { %1166 = vmatpush1.bf16.msra.mxu0 %v3099_v22  ;;  %v3157_v9 = vld [vmem:[#allocation7 + $0x3c4] ss:$20 sps:$4 sm:$0xff]   ;;  %v3160_v11 = vld [vmem:[#allocation7 + $0x3c0] ss:$20 sps:$4 sm:$0xff]   ;;  %v3170_v16 = vld [vmem:[#allocation7 + $0xfc] ss:$20 sps:$4 sm:$0xff]  }
  0x4b   :  { %1207 = vmatpush1.bf16.msra.mxu1 %v3100_v23  ;;  %1167 = vmatprep.subr.bf16.mxu0 %v3101_v24  ;;  %v3164_v12 = vld [vmem:[#allocation7 + $0x124] ss:$20 sps:$4 sm:$0xff]   ;;  %v3162_v14 = vld [vmem:[#allocation7 + $0x120] ss:$20 sps:$4 sm:$0xff]   ;;  %v3173_v17 = vld [vmem:[#allocation7 + $0x37c] ss:$20 sps:$4 sm:$0xff]  }
  0x4c   :  { %1208 = vmatprep.subr.bf16.mxu1 %v3103_v25  ;;  %1187 = vmatprep.mubr.bf16.mxu0 %v3705_v59  ;;  %v3167_v13 = vld [vmem:[#allocation7 + $0x3a4] ss:$20 sps:$4 sm:$0xff]   ;;  %v3165_v15 = vld [vmem:[#allocation7 + $0x3a0] ss:$20 sps:$4 sm:$0xff]   ;;  %v3204_v43 = vld [vmem:[#allocation7 + $0x8] ss:$20 sps:$4 sm:$0xff]  }
  0x4d   :  { %1228 = vmatprep.mubr.bf16.mxu1 %v3712_v62  ;;  %v3168_v18 = vld [vmem:[#allocation7 + $0xf8] ss:$20 sps:$4 sm:$0xff]   ;;  %v3176_v20 = vld [vmem:[#allocation7 + $0xd4] ss:$20 sps:$4 sm:$0xff]   ;;  %v3174_v22 = vld [vmem:[#allocation7 + $0xd0] ss:$20 sps:$4 sm:$0xff]  }
  0x4e   :  { %1168 = vmatpush1.bf16.msra.mxu0 %v3105_v26  ;;  %v3171_v19 = vld [vmem:[#allocation7 + $0x378] ss:$20 sps:$4 sm:$0xff]   ;;  %v3179_v21 = vld [vmem:[#allocation7 + $0x354] ss:$20 sps:$4 sm:$0xff]   ;;  %v3177_v23 = vld [vmem:[#allocation7 + $0x350] ss:$20 sps:$4 sm:$0xff]  }
  0x4f   :  { %1209 = vmatpush1.bf16.msra.mxu1 %v3106_v27  ;;  %1169 = vmatprep.subr.bf16.mxu0 %v3107_v28  ;;  %v3182_v24 = vld [vmem:[#allocation7 + $0xac] ss:$20 sps:$4 sm:$0xff]   ;;  %v3180_v26 = vld [vmem:[#allocation7 + $0xa8] ss:$20 sps:$4 sm:$0xff]   ;;  %v3188_v28 = vld [vmem:[#allocation7 + $0x84] ss:$20 sps:$4 sm:$0xff]  }
  0x50   :  { %1210 = vmatprep.subr.bf16.mxu1 %v3109_v29  ;;  %v3185_v25 = vld [vmem:[#allocation7 + $0x32c] ss:$20 sps:$4 sm:$0xff]   ;;  %v3183_v27 = vld [vmem:[#allocation7 + $0x328] ss:$20 sps:$4 sm:$0xff]   ;;  %v3191_v29 = vld [vmem:[#allocation7 + $0x304] ss:$20 sps:$4 sm:$0xff]  }
  0x51   :  { %v3200_v36 = vld [vmem:[#allocation7 + $0x34] ss:$20 sps:$4 sm:$0xff]   ;;  %v3198_v38 = vld [vmem:[#allocation7 + $0x30] ss:$20 sps:$4 sm:$0xff]   ;;  %v3219_v52 = vld [vmem:[#allocation7 + $0x4b8] ss:$20 sps:$4 sm:$0xff]  }
  0x52   :  { %1170 = vmatpush1.bf16.msra.mxu0 %v3111_v30  ;;  %v3186_v30 = vld [vmem:[#allocation7 + $0x80] ss:$20 sps:$4 sm:$0xff]   ;;  %v3218_v49 = vld [vmem:[#allocation7 + $0x23c] ss:$20 sps:$4 sm:$0xff]  }
  0x53   :  { %1211 = vmatpush1.bf16.msra.mxu1 %v3112_v31  ;;  %1171 = vmatprep.subr.bf16.mxu0 %v3113_v32  ;;  %v3189_v31 = vld [vmem:[#allocation7 + $0x300] ss:$20 sps:$4 sm:$0xff]   ;;  %v3194_v32 = vld [vmem:[#allocation7 + $0x5c] ss:$20 sps:$4 sm:$0xff]  }
  0x54   :  { %1212 = vmatprep.subr.bf16.mxu1 %v3115_v33  ;;  %v3197_v33 = vld [vmem:[#allocation7 + $0x2dc] ss:$20 sps:$4 sm:$0xff]   ;;  %v3203_v37 = vld [vmem:[#allocation7 + $0x2b4] ss:$20 sps:$4 sm:$0xff]  }
  0x55   :  { %v3227_v55 = vld [vmem:[#allocation7 + $0x494] ss:$20 sps:$4 sm:$0xff]  }
  0x56   :  { %1172 = vmatpush2.bf16.msra.mxu0 %v3117_v34  ;;  %v3192_v34 = vld [vmem:[#allocation7 + $0x58] ss:$20 sps:$4 sm:$0xff]  }
  0x57   :  { %1213 = vmatpush2.bf16.msra.mxu1 %v3118_v35  ;;  %1173 = vmatprep.subr.bf16.mxu0 %v3119_v39  ;;  %v3195_v35 = vld [vmem:[#allocation7 + $0x2d8] ss:$20 sps:$4 sm:$0xff]   ;;  %v3201_v39 = vld [vmem:[#allocation7 + $0x2b0] ss:$20 sps:$4 sm:$0xff]  }
  0x58   :  { %1214 = vmatprep.subr.bf16.mxu1 %v3121_v40  ;;  %v3206_v40 = vld [vmem:[#allocation7 + $0xc] ss:$20 sps:$4 sm:$0xff]  }
  0x5a   :  { %1174 = vmatpush2.bf16.msra.mxu0 %v3123_v41  ;;  %v3209_v41 = vld [vmem:[#allocation7 + $0x28c] ss:$20 sps:$4 sm:$0xff]  }
  0x5b   :  { %1215 = vmatpush2.bf16.msra.mxu1 %v3124_v44  ;;  %1175 = vmatprep.subr.bf16.mxu0 %v3125_v45  ;;  %v3207_v44 = vld [vmem:[#allocation7 + $0x288] ss:$20 sps:$4 sm:$0xff]   ;;  %v3212_v45 = vld [vmem:[#allocation7 + $0x264] ss:$20 sps:$4 sm:$0xff]  }
  0x5c   :  { %1216 = vmatprep.subr.bf16.mxu1 %v3127_v46  ;;  %v3215_v46 = vld [vmem:[#allocation7 + $0x4e4] ss:$20 sps:$4 sm:$0xff]  }
  0x5e   :  { %1176 = vmatpush2.bf16.msra.mxu0 %v3129_v47  ;;  %v3210_v47 = vld [vmem:[#allocation7 + $0x260] ss:$20 sps:$4 sm:$0xff]  }
  0x5f   :  { %1217 = vmatpush2.bf16.msra.mxu1 %v3130_v48  ;;  %1177 = vmatprep.subr.bf16.mxu0 %v3131_v50  ;;  %v3213_v48 = vld [vmem:[#allocation7 + $0x4e0] ss:$20 sps:$4 sm:$0xff]   ;;  %v3221_v50 = vld [vmem:[#allocation7 + $0x4bc] ss:$20 sps:$4 sm:$0xff]  }
  0x60   :  { %1218 = vmatprep.subr.bf16.mxu1 %v3133_v51  ;;  %v3216_v51 = vld [vmem:[#allocation7 + $0x238] ss:$20 sps:$4 sm:$0xff]  }
  0x62   :  { %1178 = vmatpush2.bf16.msra.mxu0 %v3135_v53  ;;  %v3224_v53 = vld [vmem:[#allocation7 + $0x214] ss:$20 sps:$4 sm:$0xff]  }
  0x63   :  { %1219 = vmatpush2.bf16.msra.mxu1 %v3136_v56  ;;  %1179 = vmatprep.subr.bf16.mxu0 %v3137_v57  ;;  %v3222_v56 = vld [vmem:[#allocation7 + $0x210] ss:$20 sps:$4 sm:$0xff]  }
  0x64   :  { %1220 = vmatprep.subr.bf16.mxu1 %v3139_v58  ;;  %v3225_v57 = vld [vmem:[#allocation7 + $0x490] ss:$20 sps:$4 sm:$0xff]   ;;  %v3230_v58 = vld [vmem:[#allocation7 + $0x1ec] ss:$20 sps:$4 sm:$0xff]  }
  0x66   :  { %1180 = vmatpush2.bf16.msra.mxu0 %v3141_v61  ;;  %v3233_v61 = vld [vmem:[#allocation7 + $0x46c] ss:$20 sps:$4 sm:$0xff]  }
  0x67   :  { %1221 = vmatpush2.bf16.msra.mxu1 %v3142_v63  ;;  %1181 = vmatprep.subr.bf16.mxu0 %v3143_v0  ;;  %v3228_v63 = vld [vmem:[#allocation7 + $0x1e8] ss:$20 sps:$4 sm:$0xff]  }
  0x68   :  { %1222 = vmatprep.subr.bf16.mxu1 %v3145_v1  ;;  %v3231_v0 = vld [vmem:[#allocation7 + $0x468] ss:$20 sps:$4 sm:$0xff]   ;;  %v3236_v1 = vld [vmem:[#allocation7 + $0x1c4] ss:$20 sps:$4 sm:$0xff]  }
  0x6a   :  { %1182 = vmatpush2.bf16.msra.mxu0 %v3147_v2  ;;  %v3239_v2 = vld [vmem:[#allocation7 + $0x444] ss:$20 sps:$4 sm:$0xff]  }
  0x6b   :  { %1223 = vmatpush2.bf16.msra.mxu1 %v3148_v3  ;;  %1183 = vmatprep.subr.bf16.mxu0 %v3149_v4  ;;  %v3234_v3 = vld [vmem:[#allocation7 + $0x1c0] ss:$20 sps:$4 sm:$0xff]  }
  0x6c   :  { %1224 = vmatprep.subr.bf16.mxu1 %v3151_v5  ;;  %v3237_v4 = vld [vmem:[#allocation7 + $0x440] ss:$20 sps:$4 sm:$0xff]   ;;  %v3242_v5 = vld [vmem:[#allocation7 + $0x19c] ss:$20 sps:$4 sm:$0xff]  }
  0x6e   :  { %1184 = vmatpush2.bf16.msra.mxu0 %v3153_v6  ;;  %v3245_v6 = vld [vmem:[#allocation7 + $0x41c] ss:$20 sps:$4 sm:$0xff]  }
  0x6f   :  { %1225 = vmatpush2.bf16.msra.mxu1 %v3154_v7  ;;  %1185 = vmatprep.subr.bf16.mxu0 %v3155_v8  ;;  %v3240_v7 = vld [vmem:[#allocation7 + $0x198] ss:$20 sps:$4 sm:$0xff]  }
  0x70   :  { %1226 = vmatprep.subr.bf16.mxu1 %v3157_v9  ;;  %v3243_v8 = vld [vmem:[#allocation7 + $0x418] ss:$20 sps:$4 sm:$0xff]   ;;  %v3248_v9 = vld [vmem:[#allocation7 + $0x174] ss:$20 sps:$4 sm:$0xff]  }
  0x72   :  { %1186 = vmatpush2.bf16.msra.mxu0 %v3159_v10  ;;  %v3251_v10 = vld [vmem:[#allocation7 + $0x3f4] ss:$20 sps:$4 sm:$0xff]  }
  0x73   :  { %1227 = vmatpush2.bf16.msra.mxu1 %v3160_v11  ;;  %1237 = vmatprep.subr.bf16.mxu0 %v3164_v12  ;;  %v3246_v11 = vld [vmem:[#allocation7 + $0x170] ss:$20 sps:$4 sm:$0xff]  }
  0x74   :  { %1278 = vmatprep.subr.bf16.mxu1 %v3167_v13  ;;  %v3249_v12 = vld [vmem:[#allocation7 + $0x3f0] ss:$20 sps:$4 sm:$0xff]   ;;  %v3254_v13 = vld [vmem:[#allocation7 + $0x14c] ss:$20 sps:$4 sm:$0xff]  }
  0x75   :  { %1188 = vmatmul.mubr.bf16.vlgmr.msra.gmra.mxu0 %v3701_v54 }
  0x76   :  { %1229 = vmatmul.mubr.bf16.vlgmr.msra.gmra.mxu1 %v3707_v60  ;;  %1238 = vmatpush1.bf16.msra.mxu0 %v3162_v14  ;;  %v3257_v14 = vld [vmem:[#allocation7 + $0x3cc] ss:$20 sps:$4 sm:$0xff]  }
  0x77   :  { %1279 = vmatpush1.bf16.msra.mxu1 %v3165_v15  ;;  %1239 = vmatprep.subr.bf16.mxu0 %v3170_v16  ;;  %v3252_v15 = vld [vmem:[#allocation7 + $0x148] ss:$20 sps:$4 sm:$0xff]  }
  0x78   :  { %1280 = vmatprep.subr.bf16.mxu1 %v3173_v17  ;;  %1269 = vmatprep.mubr.bf16.mxu0 %v3705_v59  ;;  %v3255_v16 = vld [vmem:[#allocation7 + $0x3c8] ss:$20 sps:$4 sm:$0xff]  }
  0x79   :  { %1310 = vmatprep.mubr.bf16.mxu1 %v3712_v62  ;;  %v3258_v17 = vld [vmem:[#allocation7 + $0x268] ss:$20 sps:$4 sm:$0xff]  }
  0x7a   :  { %1240 = vmatpush1.bf16.msra.mxu0 %v3168_v18  ;;  %v3259_v18 = vld [vmem:[#allocation7 + $0x4e8] ss:$20 sps:$4 sm:$0xff]  }
  0x7b   :  { %1281 = vmatpush1.bf16.msra.mxu1 %v3171_v19  ;;  %1241 = vmatprep.subr.bf16.mxu0 %v3176_v20  ;;  %v3260_v19 = vld [vmem:[#allocation7 + $0x128] ss:$20 sps:$4 sm:$0xff]  }
  0x7c   :  { %1282 = vmatprep.subr.bf16.mxu1 %v3179_v21  ;;  %v3261_v20 = vld [vmem:[#allocation7 + $0x3a8] ss:$20 sps:$4 sm:$0xff]   ;;  %v3262_v21 = vld [vmem:[#allocation7 + $0x240] ss:$20 sps:$4 sm:$0xff]  }
  0x7e   :  { %1242 = vmatpush1.bf16.msra.mxu0 %v3174_v22  ;;  %v3263_v22 = vld [vmem:[#allocation7 + $0x4c0] ss:$20 sps:$4 sm:$0xff]  }
  0x7f   :  { %1283 = vmatpush1.bf16.msra.mxu1 %v3177_v23  ;;  %1243 = vmatprep.subr.bf16.mxu0 %v3182_v24  ;;  %v3264_v23 = vld [vmem:[#allocation7 + $0x100] ss:$20 sps:$4 sm:$0xff]  }
  0x80   :  { %1284 = vmatprep.subr.bf16.mxu1 %v3185_v25  ;;  %v3265_v24 = vld [vmem:[#allocation7 + $0x380] ss:$20 sps:$4 sm:$0xff]   ;;  %v3266_v25 = vld [vmem:[#allocation7 + $0x218] ss:$20 sps:$4 sm:$0xff]  }
  0x82   :  { %1244 = vmatpush1.bf16.msra.mxu0 %v3180_v26  ;;  %v3267_v26 = vld [vmem:[#allocation7 + $0x498] ss:$20 sps:$4 sm:$0xff]  }
  0x83   :  { %1285 = vmatpush1.bf16.msra.mxu1 %v3183_v27  ;;  %1245 = vmatprep.subr.bf16.mxu0 %v3188_v28  ;;  %v3268_v27 = vld [vmem:[#allocation7 + $0xd8] ss:$20 sps:$4 sm:$0xff]  }
  0x84   :  { %1286 = vmatprep.subr.bf16.mxu1 %v3191_v29  ;;  %v3269_v28 = vld [vmem:[#allocation7 + $0x358] ss:$20 sps:$4 sm:$0xff]   ;;  %v3270_v29 = vld [vmem:[#allocation7 + $0x1f0] ss:$20 sps:$4 sm:$0xff]  }
  0x86   :  { %1246 = vmatpush1.bf16.msra.mxu0 %v3186_v30  ;;  %v3271_v30 = vld [vmem:[#allocation7 + $0x470] ss:$20 sps:$4 sm:$0xff]  }
  0x87   :  { %1287 = vmatpush1.bf16.msra.mxu1 %v3189_v31  ;;  %1247 = vmatprep.subr.bf16.mxu0 %v3194_v32  ;;  %v3272_v31 = vld [vmem:[#allocation7 + $0xb0] ss:$20 sps:$4 sm:$0xff]  }
  0x88   :  { %1288 = vmatprep.subr.bf16.mxu1 %v3197_v33  ;;  %v3273_v32 = vld [vmem:[#allocation7 + $0x330] ss:$20 sps:$4 sm:$0xff]   ;;  %v3274_v33 = vld [vmem:[#allocation7 + $0x1c8] ss:$20 sps:$4 sm:$0xff]  }
  0x8a   :  { %1248 = vmatpush1.bf16.msra.mxu0 %v3192_v34  ;;  %v3275_v34 = vld [vmem:[#allocation7 + $0x448] ss:$20 sps:$4 sm:$0xff]  }
  0x8b   :  { %1289 = vmatpush1.bf16.msra.mxu1 %v3195_v35  ;;  %1249 = vmatprep.subr.bf16.mxu0 %v3200_v36  ;;  %v3278_v35 = vld [vmem:[#allocation7 + $0x1a0] ss:$20 sps:$4 sm:$0xff]  }
  0x8c   :  { %1290 = vmatprep.subr.bf16.mxu1 %v3203_v37  ;;  %v3279_v36 = vld [vmem:[#allocation7 + $0x420] ss:$20 sps:$4 sm:$0xff]  }
  0x8d   :  { %v3280_v37 = vld [vmem:[#allocation7 + $0x60] ss:$20 sps:$4 sm:$0xff]  }
  0x8e   :  { %1250 = vmatpush1.bf16.msra.mxu0 %v3198_v38  ;;  %v3281_v38 = vld [vmem:[#allocation7 + $0x2e0] ss:$20 sps:$4 sm:$0xff]  }
  0x8f   :  { %1291 = vmatpush1.bf16.msra.mxu1 %v3201_v39  ;;  %1251 = vmatprep.subr.bf16.mxu0 %v3206_v40  ;;  %v3282_v39 = vld [vmem:[#allocation7 + $0x178] ss:$20 sps:$4 sm:$0xff]  }
  0x90   :  { %1292 = vmatprep.subr.bf16.mxu1 %v3209_v41  ;;  %v3283_v40 = vld [vmem:[#allocation7 + $0x3f8] ss:$20 sps:$4 sm:$0xff]  }
  0x91   :  { %v3284_v41 = vld [vmem:[#allocation7 + $0x38] ss:$20 sps:$4 sm:$0xff]  }
  0x92   :  { %1252 = vmatpush1.bf16.msra.mxu0 %v3204_v43  ;;  %v3285_v43 = vld [vmem:[#allocation7 + $0x2b8] ss:$20 sps:$4 sm:$0xff]  }
  0x93   :  { %1293 = vmatpush1.bf16.msra.mxu1 %v3207_v44  ;;  %1253 = vmatprep.subr.bf16.mxu0 %v3212_v45  ;;  %v3286_v44 = vld [vmem:[#allocation7 + $0x150] ss:$20 sps:$4 sm:$0xff]  }
  0x94   :  { %1294 = vmatprep.subr.bf16.mxu1 %v3215_v46  ;;  %v3287_v45 = vld [vmem:[#allocation7 + $0x3d0] ss:$20 sps:$4 sm:$0xff]  }
  0x95   :  { %v3288_v46 = vld [vmem:[#allocation7 + $0x10] ss:$20 sps:$4 sm:$0xff]  }
  0x96   :  { %1254 = vmatpush2.bf16.msra.mxu0 %v3210_v47  ;;  %v3289_v47 = vld [vmem:[#allocation7 + $0x290] ss:$20 sps:$4 sm:$0xff]  }
  0x97   :  { %1295 = vmatpush2.bf16.msra.mxu1 %v3213_v48  ;;  %1255 = vmatprep.subr.bf16.mxu0 %v3218_v49  ;;  %v3292_v48 = vld [vmem:[#allocation8 + $0xe4] ss:$16 sps:$4 sm:$0xff]  }
  0x98   :  { %1296 = vmatprep.subr.bf16.mxu1 %v3221_v50  ;;  %v3340_v49 = vld [vmem:[#allocation8 + $0x2e4] ss:$16 sps:$4 sm:$0xff]   ;;  %v3290_v50 = vld [vmem:[#allocation8 + $0xe0] ss:$16 sps:$4 sm:$0xff]  }
  0x9a   :  { %1256 = vmatpush2.bf16.msra.mxu0 %v3216_v51  ;;  %v3338_v51 = vld [vmem:[#allocation8 + $0x2e0] ss:$16 sps:$4 sm:$0xff]  }
  0x9b   :  { %1297 = vmatpush2.bf16.msra.mxu1 %v3219_v52  ;;  %1257 = vmatprep.subr.bf16.mxu0 %v3224_v53  ;;  %v3295_v52 = vld [vmem:[#allocation8 + $0xc4] ss:$16 sps:$4 sm:$0xff]  }
  0x9c   :  { %1298 = vmatprep.subr.bf16.mxu1 %v3227_v55  ;;  %v3343_v53 = vld [vmem:[#allocation8 + $0x2c4] ss:$16 sps:$4 sm:$0xff]   ;;  %v3293_v55 = vld [vmem:[#allocation8 + $0xc0] ss:$16 sps:$4 sm:$0xff]  }
  0x9e   :  { %1258 = vmatpush2.bf16.msra.mxu0 %v3222_v56  ;;  %v3341_v56 = vld [vmem:[#allocation8 + $0x2c0] ss:$16 sps:$4 sm:$0xff]  }
  0x9f   :  { %1299 = vmatpush2.bf16.msra.mxu1 %v3225_v57  ;;  %1259 = vmatprep.subr.bf16.mxu0 %v3230_v58  ;;  %v3298_v57 = vld [vmem:[#allocation8 + $0xa4] ss:$16 sps:$4 sm:$0xff]  }
  0xa0   :  { %1300 = vmatprep.subr.bf16.mxu1 %v3233_v61  ;;  %v3346_v58 = vld [vmem:[#allocation8 + $0x2a4] ss:$16 sps:$4 sm:$0xff]   ;;  %v3296_v61 = vld [vmem:[#allocation8 + $0xa0] ss:$16 sps:$4 sm:$0xff]  }
  0xa2   :  { %1260 = vmatpush2.bf16.msra.mxu0 %v3228_v63  ;;  %v3344_v63 = vld [vmem:[#allocation8 + $0x2a0] ss:$16 sps:$4 sm:$0xff]  }
  0xa3   :  { %1301 = vmatpush2.bf16.msra.mxu1 %v3231_v0  ;;  %1261 = vmatprep.subr.bf16.mxu0 %v3236_v1  ;;  %v3301_v0 = vld [vmem:[#allocation8 + $0x84] ss:$16 sps:$4 sm:$0xff]  }
  0xa4   :  { %1302 = vmatprep.subr.bf16.mxu1 %v3239_v2  ;;  %v3349_v1 = vld [vmem:[#allocation8 + $0x284] ss:$16 sps:$4 sm:$0xff]   ;;  %v3299_v2 = vld [vmem:[#allocation8 + $0x80] ss:$16 sps:$4 sm:$0xff]  }
  0xa6   :  { %1262 = vmatpush2.bf16.msra.mxu0 %v3234_v3  ;;  %v3347_v3 = vld [vmem:[#allocation8 + $0x280] ss:$16 sps:$4 sm:$0xff]  }
  0xa7   :  { %1303 = vmatpush2.bf16.msra.mxu1 %v3237_v4  ;;  %1263 = vmatprep.subr.bf16.mxu0 %v3242_v5  ;;  %v3304_v4 = vld [vmem:[#allocation8 + $0x64] ss:$16 sps:$4 sm:$0xff]   ;;  %v3350_v5 = vld [vmem:[#allocation8 + $0x260] ss:$16 sps:$4 sm:$0xff]  }
  0xa8   :  { %1304 = vmatprep.subr.bf16.mxu1 %v3245_v6  ;;  %v3307_v6 = vld [vmem:[#allocation8 + $0x44] ss:$16 sps:$4 sm:$0xff]  }
  0xaa   :  { %1264 = vmatpush2.bf16.msra.mxu0 %v3240_v7  ;;  %v3355_v7 = vld [vmem:[#allocation8 + $0x244] ss:$16 sps:$4 sm:$0xff]  }
  0xab   :  { %1305 = vmatpush2.bf16.msra.mxu1 %v3243_v8  ;;  %1265 = vmatprep.subr.bf16.mxu0 %v3248_v9  ;;  %v3305_v8 = vld [vmem:[#allocation8 + $0x40] ss:$16 sps:$4 sm:$0xff]  }
  0xac   :  { %1306 = vmatprep.subr.bf16.mxu1 %v3251_v10  ;;  %v3353_v9 = vld [vmem:[#allocation8 + $0x240] ss:$16 sps:$4 sm:$0xff]   ;;  %v3310_v10 = vld [vmem:[#allocation8 + $0x24] ss:$16 sps:$4 sm:$0xff]  }
  0xae   :  { %1266 = vmatpush2.bf16.msra.mxu0 %v3246_v11  ;;  %v3358_v11 = vld [vmem:[#allocation8 + $0x224] ss:$16 sps:$4 sm:$0xff]  }
  0xaf   :  { %1307 = vmatpush2.bf16.msra.mxu1 %v3249_v12  ;;  %1267 = vmatprep.subr.bf16.mxu0 %v3254_v13  ;;  %v3308_v12 = vld [vmem:[#allocation8 + $0x20] ss:$16 sps:$4 sm:$0xff]  }
  0xb0   :  { %1308 = vmatprep.subr.bf16.mxu1 %v3257_v14  ;;  %v3356_v13 = vld [vmem:[#allocation8 + $0x220] ss:$16 sps:$4 sm:$0xff]   ;;  %v3313_v14 = vld [vmem:[#allocation8 + $0x4] ss:$16 sps:$4 sm:$0xff]  }
  0xb2   :  { %1268 = vmatpush2.bf16.msra.mxu0 %v3252_v15  ;;  %v3361_v15 = vld [vmem:[#allocation8 + $0x204] ss:$16 sps:$4 sm:$0xff]  }
  0xb3   :  { %1309 = vmatpush2.bf16.msra.mxu1 %v3255_v16  ;;  %3010 = vmatprep.subr.bf16.mxu0 %v3258_v17  ;;  %v3311_v16 = vld [vmem:[#allocation8] ss:$16 sps:$4 sm:$0xff]  }
  0xb4   :  { %3032 = vmatprep.subr.bf16.mxu1 %v3259_v18  ;;  %v3359_v17 = vld [vmem:[#allocation8 + $0x200] ss:$16 sps:$4 sm:$0xff]   ;;  %v3316_v18 = vld [vmem:[#allocation8 + $0x1e4] ss:$16 sps:$4 sm:$0xff]  }
  0xb5   :  { %1270 = vmatmul.mubr.bf16.vlgmr.msra.gmra.mxu0 %v3701_v54 }
  0xb6   :  { %1311 = vmatmul.mubr.bf16.vlgmr.msra.gmra.mxu1 %v3707_v60  ;;  %3011 = vmatpush3.bf16.msra.mxu0 %v3260_v19  ;;  %v3364_v19 = vld [vmem:[#allocation8 + $0x3e4] ss:$16 sps:$4 sm:$0xff]  }
  0xb7   :  { %3033 = vmatpush3.bf16.msra.mxu1 %v3261_v20  ;;  %3012 = vmatprep.subr.bf16.mxu0 %v3262_v21  ;;  %v3314_v20 = vld [vmem:[#allocation8 + $0x1e0] ss:$16 sps:$4 sm:$0xff]  }
  0xb8   :  { %3034 = vmatprep.subr.bf16.mxu1 %v3263_v22  ;;  %1351 = vmatprep.mubr.bf16.mxu0 %v3705_v59  ;;  %v3276_v59 = vld [vmem:[#allocation7 + $0x88] ss:$20 sps:$4 sm:$0xff]   ;;  %v3362_v21 = vld [vmem:[#allocation8 + $0x3e0] ss:$16 sps:$4 sm:$0xff]   ;;  %v3319_v22 = vld [vmem:[#allocation8 + $0x1c4] ss:$16 sps:$4 sm:$0xff]  }
  0xb9   :  { %1391 = vmatprep.mubr.bf16.mxu1 %v3712_v62  ;;  %v3277_v62 = vld [vmem:[#allocation7 + $0x308] ss:$20 sps:$4 sm:$0xff]  }
  0xba   :  { %3013 = vmatpush3.bf16.msra.mxu0 %v3264_v23  ;;  %v3367_v23 = vld [vmem:[#allocation8 + $0x3c4] ss:$16 sps:$4 sm:$0xff]  }
  0xbb   :  { %3035 = vmatpush3.bf16.msra.mxu1 %v3265_v24  ;;  %3014 = vmatprep.subr.bf16.mxu0 %v3266_v25  ;;  %v3317_v24 = vld [vmem:[#allocation8 + $0x1c0] ss:$16 sps:$4 sm:$0xff]  }
  0xbc   :  { %3036 = vmatprep.subr.bf16.mxu1 %v3267_v26  ;;  %v3365_v25 = vld [vmem:[#allocation8 + $0x3c0] ss:$16 sps:$4 sm:$0xff]   ;;  %v3322_v26 = vld [vmem:[#allocation8 + $0x1a4] ss:$16 sps:$4 sm:$0xff]  }
  0xbe   :  { %3015 = vmatpush3.bf16.msra.mxu0 %v3268_v27  ;;  %v3370_v27 = vld [vmem:[#allocation8 + $0x3a4] ss:$16 sps:$4 sm:$0xff]  }
  0xbf   :  { %3037 = vmatpush3.bf16.msra.mxu1 %v3269_v28  ;;  %3016 = vmatprep.subr.bf16.mxu0 %v3270_v29  ;;  %v3320_v28 = vld [vmem:[#allocation8 + $0x1a0] ss:$16 sps:$4 sm:$0xff]  }
  0xc0   :  { %3038 = vmatprep.subr.bf16.mxu1 %v3271_v30  ;;  %v3368_v29 = vld [vmem:[#allocation8 + $0x3a0] ss:$16 sps:$4 sm:$0xff]   ;;  %v3325_v30 = vld [vmem:[#allocation8 + $0x184] ss:$16 sps:$4 sm:$0xff]  }
  0xc2   :  { %3017 = vmatpush3.bf16.msra.mxu0 %v3272_v31  ;;  %v3373_v31 = vld [vmem:[#allocation8 + $0x384] ss:$16 sps:$4 sm:$0xff]  }
  0xc3   :  { %3039 = vmatpush3.bf16.msra.mxu1 %v3273_v32  ;;  %3018 = vmatprep.subr.bf16.mxu0 %v3274_v33  ;;  %v3323_v32 = vld [vmem:[#allocation8 + $0x180] ss:$16 sps:$4 sm:$0xff]  }
  0xc4   :  { %3040 = vmatprep.subr.bf16.mxu1 %v3275_v34  ;;  %v3371_v33 = vld [vmem:[#allocation8 + $0x380] ss:$16 sps:$4 sm:$0xff]   ;;  %v3328_v34 = vld [vmem:[#allocation8 + $0x164] ss:$16 sps:$4 sm:$0xff]  }
  0xc6   :  { %3019 = vmatpush3.bf16.msra.mxu0 %v3276_v59  ;;  %v3376_v59 = vld [vmem:[#allocation8 + $0x364] ss:$16 sps:$4 sm:$0xff]  }
  0xc7   :  { %3041 = vmatpush3.bf16.msra.mxu1 %v3277_v62  ;;  %3020 = vmatprep.subr.bf16.mxu0 %v3278_v35  ;;  %v3326_v62 = vld [vmem:[#allocation8 + $0x160] ss:$16 sps:$4 sm:$0xff]  }
  0xc8   :  { %3042 = vmatprep.subr.bf16.mxu1 %v3279_v36  ;;  %v3374_v35 = vld [vmem:[#allocation8 + $0x360] ss:$16 sps:$4 sm:$0xff]   ;;  %v3331_v36 = vld [vmem:[#allocation8 + $0x144] ss:$16 sps:$4 sm:$0xff]  }
  0xca   :  { %3021 = vmatpush3.bf16.msra.mxu0 %v3280_v37  ;;  %v3379_v37 = vld [vmem:[#allocation8 + $0x344] ss:$16 sps:$4 sm:$0xff]  }
  0xcb   :  { %3043 = vmatpush3.bf16.msra.mxu1 %v3281_v38  ;;  %3022 = vmatprep.subr.bf16.mxu0 %v3282_v39  ;;  %v3329_v38 = vld [vmem:[#allocation8 + $0x140] ss:$16 sps:$4 sm:$0xff]  }
  0xcc   :  { %3044 = vmatprep.subr.bf16.mxu1 %v3283_v40  ;;  %v3377_v39 = vld [vmem:[#allocation8 + $0x340] ss:$16 sps:$4 sm:$0xff]   ;;  %v3334_v40 = vld [vmem:[#allocation8 + $0x124] ss:$16 sps:$4 sm:$0xff]  }
  0xce   :  { %3023 = vmatpush3.bf16.msra.mxu0 %v3284_v41  ;;  %v3382_v41 = vld [vmem:[#allocation8 + $0x324] ss:$16 sps:$4 sm:$0xff]  }
  0xcf   :  { %3045 = vmatpush3.bf16.msra.mxu1 %v3285_v43  ;;  %3024 = vmatprep.subr.bf16.mxu0 %v3286_v44  ;;  %v3332_v43 = vld [vmem:[#allocation8 + $0x120] ss:$16 sps:$4 sm:$0xff]  }
  0xd0   :  { %3046 = vmatprep.subr.bf16.mxu1 %v3287_v45  ;;  %v3380_v44 = vld [vmem:[#allocation8 + $0x320] ss:$16 sps:$4 sm:$0xff]   ;;  %v3337_v45 = vld [vmem:[#allocation8 + $0x104] ss:$16 sps:$4 sm:$0xff]  }
  0xd2   :  { %3025 = vmatpush3.bf16.msra.mxu0 %v3288_v46  ;;  %v3385_v46 = vld [vmem:[#allocation8 + $0x304] ss:$16 sps:$4 sm:$0xff]  }
  0xd3   :  { %3047 = vmatpush3.bf16.msra.mxu1 %v3289_v47  ;;  %2397 = vmatprep.subr.bf16.mxu0 %v3292_v48  ;;  %v3335_v47 = vld [vmem:[#allocation8 + $0x100] ss:$16 sps:$4 sm:$0xff]  }
  0xd4   :  { %2438 = vmatprep.subr.bf16.mxu1 %v3340_v49  ;;  %v3383_v48 = vld [vmem:[#allocation8 + $0x300] ss:$16 sps:$4 sm:$0xff]   ;;  %v3388_v49 = vld [vmem:[#allocation8 + $0xec] ss:$16 sps:$4 sm:$0xff]  }
  0xd5   :  { %1352 = vmatmul.mubr.bf16.vlgmr.msra.gmra.mxu0 %v3701_v54  ;;  %v3352_v54 = vld [vmem:[#allocation8 + $0x264] ss:$16 sps:$4 sm:$0xff]  }
  0xd6   :  { %1392 = vmatmul.mubr.bf16.vlgmr.msra.gmra.mxu1 %v3707_v60  ;;  %2398 = vmatpush1.bf16.msra.mxu0 %v3290_v50  ;;  %v3302_v60 = vld [vmem:[#allocation8 + $0x60] ss:$16 sps:$4 sm:$0xff]   ;;  %v3391_v50 = vld [vmem:[#allocation8 + $0x4e4] ss:$16 sps:$4 sm:$0xff]  }
  0xd7   :  { %2439 = vmatpush1.bf16.msra.mxu1 %v3338_v51  ;;  %2399 = vmatprep.subr.bf16.mxu0 %v3295_v52  ;;  %v278_v51 = vsub.s32 0, %v3698_v42  ;;  %v3729_v52 = vld [vmem:[%s3787_s3] sm:$0x1f] }
  0xd8   :  { %2440 = vmatprep.subr.bf16.mxu1 %v3343_v53  ;;  %v282_v53 = vsub.s32 1, %v3698_v42 }
  0xda   :  { %2400 = vmatpush1.bf16.msra.mxu0 %v3293_v55  ;;  %v77_v55 = vld [vmem:[#allocation5] sm:$0xff] }
  0xdb   :  { %2441 = vmatpush1.bf16.msra.mxu1 %v3341_v56  ;;  %2401 = vmatprep.subr.bf16.mxu0 %v3298_v57  ;;  %v279_v56 = vrot.slane %v3729_v52, %v278_v51  ;;  %v79_v57 = vunpack.c.l.bf16 %v77_v55 }
  0xdc   :  { %2442 = vmatprep.subr.bf16.mxu1 %v3346_v58  ;;  %v283_v58 = vrot.slane %v3729_v52, %v282_v53 }
  0xde   :  { %2402 = vmatpush1.bf16.msra.mxu0 %v3296_v61 }
  0xdf   :  { %2443 = vmatpush1.bf16.msra.mxu1 %v3344_v63  ;;  %2403 = vmatprep.subr.bf16.mxu0 %v3301_v0 }
  0xe0   :  { %2444 = vmatprep.subr.bf16.mxu1 %v3349_v1 }
  0xe2   :  { %2404 = vmatpush1.bf16.msra.mxu0 %v3299_v2 }
  0xe3   :  { %2445 = vmatpush1.bf16.msra.mxu1 %v3347_v3  ;;  %2405 = vmatprep.subr.bf16.mxu0 %v3304_v4 }
  0xe4   :  { %2446 = vmatprep.subr.bf16.mxu1 %v3352_v54  ;;  %v1401_v54 = vcombine.high %v79_v57, %v79_v57 }
  0xe6   :  { %2406 = vmatpush1.bf16.msra.mxu0 %v3302_v60 }
  0xe7   :  { %2447 = vmatpush1.bf16.msra.mxu1 %v3350_v5  ;;  %2407 = vmatprep.subr.bf16.mxu0 %v3307_v6 }
  0xe8   :  { %2448 = vmatprep.subr.bf16.mxu1 %v3355_v7 }
  0xea   :  { %2408 = vmatpush1.bf16.msra.mxu0 %v3305_v8 }
  0xeb   :  { %2449 = vmatpush1.bf16.msra.mxu1 %v3353_v9  ;;  %2409 = vmatprep.subr.bf16.mxu0 %v3310_v10 }
  0xec   :  { %2450 = vmatprep.subr.bf16.mxu1 %v3358_v11 }
  0xee   :  { %2410 = vmatpush1.bf16.msra.mxu0 %v3308_v12  ;;  %v3389_v12 = vld [vmem:[#allocation8 + $0x4e0] ss:$16 sps:$4 sm:$0xff]  }
  0xef   :  { %2451 = vmatpush1.bf16.msra.mxu1 %v3356_v13  ;;  %2411 = vmatprep.subr.bf16.mxu0 %v3313_v14  ;;  %v3397_v14 = vld [vmem:[#allocation8 + $0x4c4] ss:$16 sps:$4 sm:$0xff]  }
  0xf0   :  { %2452 = vmatprep.subr.bf16.mxu1 %v3361_v15  ;;  %v3395_v15 = vld [vmem:[#allocation8 + $0x4c0] ss:$16 sps:$4 sm:$0xff]  }
  0xf2   :  { %2412 = vmatpush1.bf16.msra.mxu0 %v3311_v16  ;;  %v3649_v16 = vmov 0  }
  0xf3   :  { %2453 = vmatpush1.bf16.msra.mxu1 %v3359_v17  ;;  %2413 = vmatprep.subr.bf16.mxu0 %v3316_v18  ;;  %v3403_v17 = vld [vmem:[#allocation8 + $0x4a4] ss:$16 sps:$4 sm:$0xff]   ;;  %v3401_v18 = vld [vmem:[#allocation8 + $0x4a0] ss:$16 sps:$4 sm:$0xff]  }
  0xf4   :  { %2454 = vmatprep.subr.bf16.mxu1 %v3364_v19  ;;  %v3409_v19 = vld [vmem:[#allocation8 + $0x484] ss:$16 sps:$4 sm:$0xff]  }
  0xf6   :  { %2414 = vmatpush2.bf16.msra.mxu0 %v3314_v20  ;;  %v3407_v20 = vld [vmem:[#allocation8 + $0x480] ss:$16 sps:$4 sm:$0xff]  }
  0xf7   :  { %2455 = vmatpush2.bf16.msra.mxu1 %v3362_v21  ;;  %2415 = vmatprep.subr.bf16.mxu0 %v3319_v22  ;;  %v3415_v21 = vld [vmem:[#allocation8 + $0x464] ss:$16 sps:$4 sm:$0xff]   ;;  %v3413_v22 = vld [vmem:[#allocation8 + $0x460] ss:$16 sps:$4 sm:$0xff]  }
  0xf8   :  { %2456 = vmatprep.subr.bf16.mxu1 %v3367_v23  ;;  %v3421_v23 = vld [vmem:[#allocation8 + $0x444] ss:$16 sps:$4 sm:$0xff]  }
  0xfa   :  { %2416 = vmatpush2.bf16.msra.mxu0 %v3317_v24  ;;  %v3419_v24 = vld [vmem:[#allocation8 + $0x440] ss:$16 sps:$4 sm:$0xff]  }
  0xfb   :  { %2457 = vmatpush2.bf16.msra.mxu1 %v3365_v25  ;;  %2417 = vmatprep.subr.bf16.mxu0 %v3322_v26  ;;  %v3427_v25 = vld [vmem:[#allocation8 + $0x424] ss:$16 sps:$4 sm:$0xff]   ;;  %v3425_v26 = vld [vmem:[#allocation8 + $0x420] ss:$16 sps:$4 sm:$0xff]  }
  0xfc   :  { %2458 = vmatprep.subr.bf16.mxu1 %v3370_v27  ;;  %v3433_v27 = vld [vmem:[#allocation8 + $0x404] ss:$16 sps:$4 sm:$0xff]  }
  0xfe   :  { %2418 = vmatpush2.bf16.msra.mxu0 %v3320_v28  ;;  %v3431_v28 = vld [vmem:[#allocation8 + $0x400] ss:$16 sps:$4 sm:$0xff]  }
  0xff   :  { %2459 = vmatpush2.bf16.msra.mxu1 %v3368_v29  ;;  %2419 = vmatprep.subr.bf16.mxu0 %v3325_v30  ;;  %v3439_v29 = vld [vmem:[#allocation8 + $0x2ec] ss:$16 sps:$4 sm:$0xff]   ;;  %v286_v30 = vsub.s32 2, %v3698_v42 }
 0x100   :  { %2460 = vmatprep.subr.bf16.mxu1 %v3373_v31  ;;  %v290_v31 = vsub.s32 3, %v3698_v42 }
 0x102   :  { %2420 = vmatpush2.bf16.msra.mxu0 %v3323_v32  ;;  %v287_v32 = vrot.slane %v3729_v52, %v286_v30 }
 0x103   :  { %2461 = vmatpush2.bf16.msra.mxu1 %v3371_v33  ;;  %2421 = vmatprep.subr.bf16.mxu0 %v3328_v34  ;;  %v80_v33 = vunpack.c.h.bf16 %v77_v55  ;;  %v291_v34 = vrot.slane %v3729_v52, %v290_v31 }
 0x104   :  { %2462 = vmatprep.subr.bf16.mxu1 %v3376_v59 }
 0x106   :  { %2422 = vmatpush2.bf16.msra.mxu0 %v3326_v62 }
 0x107   :  { %2463 = vmatpush2.bf16.msra.mxu1 %v3374_v35  ;;  %2423 = vmatprep.subr.bf16.mxu0 %v3331_v36 }
 0x108   :  { %2464 = vmatprep.subr.bf16.mxu1 %v3379_v37 }
 0x10a   :  { %2424 = vmatpush2.bf16.msra.mxu0 %v3329_v38 }
 0x10b   :  { %2465 = vmatpush2.bf16.msra.mxu1 %v3377_v39  ;;  %2425 = vmatprep.subr.bf16.mxu0 %v3334_v40  ;;  %v1402_v40 = vcombine.high %v80_v33, %v80_v33 }
 0x10c   :  { %2466 = vmatprep.subr.bf16.mxu1 %v3382_v41 }
 0x10e   :  { %2426 = vmatpush2.bf16.msra.mxu0 %v3332_v43 }
 0x10f   :  { %2467 = vmatpush2.bf16.msra.mxu1 %v3380_v44  ;;  %2427 = vmatprep.subr.bf16.mxu0 %v3337_v45 }
 0x110   :  { %2468 = vmatprep.subr.bf16.mxu1 %v3385_v46 }
 0x112   :  { %2428 = vmatpush2.bf16.msra.mxu0 %v3335_v47 }
 0x113   :  { %2469 = vmatpush2.bf16.msra.mxu1 %v3383_v48  ;;  %2479 = vmatprep.subr.bf16.mxu0 %v3391_v50  ;;  %v3386_v50 = vld [vmem:[#allocation8 + $0xe8] ss:$16 sps:$4 sm:$0xff]  }
 0x114   :  { %2520 = vmatprep.subr.bf16.mxu1 %v3388_v49 }
 0x135   :  { %v1189_v61 = vpop.f32.mrf.mxu0 }
 0x136   :  { %v1230_v63 = vpop.f32.mrf.mxu1  ;;  %v1190_v0 = vadd.f32 %v1189_v61, %v279_v56  ;;  %v3394_v56 = vld [vmem:[#allocation8 + $0xcc] ss:$16 sps:$4 sm:$0xff]   ;;  %v3398_v61 = vld [vmem:[#allocation8 + $0xa8] ss:$16 sps:$4 sm:$0xff]  }
 0x137   :  { %v1191_v1 = vpop.f32.mrf.mxu0 }
 0x138   :  { %v1232_v2 = vpop.f32.mrf.mxu1  ;;  %v1231_v3 = vadd.f32 %v1230_v63, %v1190_v0  ;;  %v1192_v4 = vadd.f32 %v1191_v1, %v283_v58  ;;  %v3400_v58 = vld [vmem:[#allocation8 + $0xac] ss:$16 sps:$4 sm:$0xff]   ;;  %v3404_v0 = vld [vmem:[#allocation8 + $0x88] ss:$16 sps:$4 sm:$0xff]  }
 0x139   :  { %v1193_v60 = vpop.f32.mrf.mxu0  ;;  %v3406_v63 = vld [vmem:[#allocation8 + $0x8c] ss:$16 sps:$4 sm:$0xff]  }
 0x13a   :  { %v1234_v5 = vpop.f32.mrf.mxu1  ;;  %v1233_v6 = vadd.f32 %v1232_v2, %v1192_v4  ;;  %v1405_v7 = vmul.f32 %v1231_v3, %v79_v57  ;;  %v3392_v57 = vld [vmem:[#allocation8 + $0xc8] ss:$16 sps:$4 sm:$0xff]   ;;  %v3412_v1 = vld [vmem:[#allocation8 + $0x6c] ss:$16 sps:$4 sm:$0xff]  }
 0x13b   :  { %v1194_v8 = vpop.f32.mrf.mxu0  ;;  %v3410_v2 = vld [vmem:[#allocation8 + $0x68] ss:$16 sps:$4 sm:$0xff]   ;;  %v3418_v3 = vld [vmem:[#allocation8 + $0x4c] ss:$16 sps:$4 sm:$0xff]  }
 0x13c   :  { %v1235_v9 = vpop.f32.mrf.mxu1  ;;  %v1406_v10 = vmul.f32 %v1401_v54, %v1233_v6  ;;  %v3740_v13 = vpack.c.bf16 %v1405_v7, %v1405_v7  ;;  %v3416_v4 = vld [vmem:[#allocation8 + $0x48] ss:$16 sps:$4 sm:$0xff]   ;;  %v294_v54 = vsub.s32 4, %v3698_v42  ;;  %v3424_v60 = vld [vmem:[#allocation8 + $0x2c] ss:$16 sps:$4 sm:$0xff]  }
 0x13d   :  { %v3422_v8 = vld [vmem:[#allocation8 + $0x28] ss:$16 sps:$4 sm:$0xff]  }
 0x13e   :  { %v3738_v11 = vpack.c.bf16 %v1406_v10, %v1406_v10  ;;  %v295_v7 = vrot.slane %v3729_v52, %v294_v54  ;;  %v78_v10 = vld [vmem:[#allocation5 + $0x8] sm:$0x3]  ;;  %v3485_v54 = vld [vmem:[#allocation8 + $0x3e8] ss:$16 sps:$4 sm:$0xff]  }
 0x140   :  { %2429 = vmatprep.mubr.bf16.mxu0 %v3738_v11 }
 0x141   :  { %2430 = vmatmul.mubr.bf16.vlgmr.msra.gmra.mxu0 %v3740_v13 }
 0x142   :  { %2480 = vmatpush1.bf16.msra.mxu0 %v3389_v12  ;;  %2511 = vmatprep.mubr.bf16.mxu0 %v3649_v16  ;;  %v3430_v12 = vld [vmem:[#allocation8 + $0xc] ss:$16 sps:$4 sm:$0xff]  }
 0x143   :  { %2481 = vmatprep.subr.bf16.mxu0 %v3397_v14 }
 0x146   :  { %2482 = vmatpush1.bf16.msra.mxu0 %v3395_v15 }
 0x147   :  { %2483 = vmatprep.subr.bf16.mxu0 %v3403_v17 }
 0x14a   :  { %2484 = vmatpush1.bf16.msra.mxu0 %v3401_v18 }
 0x14b   :  { %2485 = vmatprep.subr.bf16.mxu0 %v3409_v19  ;;  %v81_v19 = vunpack.c.l.bf16 %v78_v10  ;;  %v3494_v10 = vld [vmem:[#allocation8 + $0x4a8] ss:$16 sps:$4 sm:$0xff]  }
 0x14e   :  { %2486 = vmatpush1.bf16.msra.mxu0 %v3407_v20 }
 0x14f   :  { %2487 = vmatprep.subr.bf16.mxu0 %v3415_v21  ;;  %v3428_v21 = vld [vmem:[#allocation8 + $0x8] ss:$16 sps:$4 sm:$0xff]  }
 0x152   :  { %2488 = vmatpush1.bf16.msra.mxu0 %v3413_v22 }
 0x153   :  { %2489 = vmatprep.subr.bf16.mxu0 %v3421_v23 }
 0x156   :  { %2490 = vmatpush1.bf16.msra.mxu0 %v3419_v24  ;;  %v3436_v24 = vld [vmem:[#allocation8 + $0x1ec] ss:$16 sps:$4 sm:$0xff]  }
 0x157   :  { %2491 = vmatprep.subr.bf16.mxu0 %v3427_v25 }
 0x15a   :  { %2492 = vmatpush1.bf16.msra.mxu0 %v3425_v26  ;;  %v3434_v26 = vld [vmem:[#allocation8 + $0x1e8] ss:$16 sps:$4 sm:$0xff]  }
 0x15b   :  { %2493 = vmatprep.subr.bf16.mxu0 %v3433_v27  ;;  %v3437_v27 = vld [vmem:[#allocation8 + $0x2e8] ss:$16 sps:$4 sm:$0xff]  }
 0x15e   :  { %2494 = vmatpush1.bf16.msra.mxu0 %v3431_v28 }
 0x15f   :  { %2561 = vmatprep.subr.bf16.mxu0 %v3439_v29  ;;  %v3442_v29 = vld [vmem:[#allocation8 + $0x1cc] ss:$16 sps:$4 sm:$0xff]  }
 0x175   :  { %v1271_v59 = vpop.f32.mrf.mxu0 }
 0x176   :  { %v1312_v62 = vpop.f32.mrf.mxu1  ;;  %v1272_v35 = vadd.f32 %v1271_v59, %v287_v32  ;;  %v3445_v32 = vld [vmem:[#allocation8 + $0x2cc] ss:$16 sps:$4 sm:$0xff]  }
 0x177   :  { %v1273_v36 = vpop.f32.mrf.mxu0  ;;  %v3448_v59 = vld [vmem:[#allocation8 + $0x1ac] ss:$16 sps:$4 sm:$0xff]  }
 0x178   :  { %v1314_v37 = vpop.f32.mrf.mxu1  ;;  %v1313_v38 = vadd.f32 %v1312_v62, %v1272_v35  ;;  %v1274_v39 = vadd.f32 %v1273_v36, %v291_v34  ;;  %v3443_v34 = vld [vmem:[#allocation8 + $0x2c8] ss:$16 sps:$4 sm:$0xff]   ;;  %v3451_v62 = vld [vmem:[#allocation8 + $0x2ac] ss:$16 sps:$4 sm:$0xff]  }
 0x179   :  { %v1275_v41 = vpop.f32.mrf.mxu0  ;;  %v3446_v35 = vld [vmem:[#allocation8 + $0x1a8] ss:$16 sps:$4 sm:$0xff]  }
 0x17a   :  { %v1316_v43 = vpop.f32.mrf.mxu1  ;;  %v1315_v44 = vadd.f32 %v1314_v37, %v1274_v39  ;;  %v1407_v45 = vmul.f32 %v1313_v38, %v80_v33  ;;  %v3440_v33 = vld [vmem:[#allocation8 + $0x1c8] ss:$16 sps:$4 sm:$0xff]   ;;  %v3454_v37 = vld [vmem:[#allocation8 + $0x18c] ss:$16 sps:$4 sm:$0xff]  }
 0x17b   :  { %v1276_v46 = vpop.f32.mrf.mxu0  ;;  %v3449_v36 = vld [vmem:[#allocation8 + $0x2a8] ss:$16 sps:$4 sm:$0xff]   ;;  %v3457_v38 = vld [vmem:[#allocation8 + $0x28c] ss:$16 sps:$4 sm:$0xff]  }
 0x17c   :  { %v1317_v47 = vpop.f32.mrf.mxu1  ;;  %v1408_v48 = vmul.f32 %v1402_v40, %v1315_v44  ;;  %v3753_v55 = vpack.c.bf16 %v1407_v45, %v1407_v45  ;;  %v3452_v39 = vld [vmem:[#allocation8 + $0x188] ss:$16 sps:$4 sm:$0xff]   ;;  %v3460_v41 = vld [vmem:[#allocation8 + $0x16c] ss:$16 sps:$4 sm:$0xff]  }
 0x17d   :  { %v3455_v40 = vld [vmem:[#allocation8 + $0x288] ss:$16 sps:$4 sm:$0xff]   ;;  %v3463_v43 = vld [vmem:[#allocation8 + $0x26c] ss:$16 sps:$4 sm:$0xff]  }
 0x17e   :  { %v1413_v49 = vpack.c.bf16 %v1408_v48, %v1408_v48  ;;  %v3458_v44 = vld [vmem:[#allocation8 + $0x168] ss:$16 sps:$4 sm:$0xff]   ;;  %v3466_v46 = vld [vmem:[#allocation8 + $0x14c] ss:$16 sps:$4 sm:$0xff]  }
 0x17f   :  { %v3461_v45 = vld [vmem:[#allocation8 + $0x268] ss:$16 sps:$4 sm:$0xff]   ;;  %v3469_v47 = vld [vmem:[#allocation8 + $0x24c] ss:$16 sps:$4 sm:$0xff]  }
 0x180   :  { %2470 = vmatprep.mubr.bf16.mxu1 %v1413_v49  ;;  %v3464_v48 = vld [vmem:[#allocation8 + $0x148] ss:$16 sps:$4 sm:$0xff]  }
 0x181   :  { %2471 = vmatmul.mubr.bf16.vlgmr.msra.gmra.mxu1 %v3753_v55 }
 0x182   :  { %2521 = vmatpush1.bf16.msra.mxu1 %v3386_v50  ;;  %2552 = vmatprep.mubr.bf16.mxu1 %v3738_v11  ;;  %v3472_v50 = vld [vmem:[#allocation8 + $0x12c] ss:$16 sps:$4 sm:$0xff]  }
 0x183   :  { %2522 = vmatprep.subr.bf16.mxu1 %v3394_v56  ;;  %v3475_v56 = vld [vmem:[#allocation8 + $0x22c] ss:$16 sps:$4 sm:$0xff]  }
 0x186   :  { %2523 = vmatpush1.bf16.msra.mxu1 %v3392_v57  ;;  %v3470_v57 = vld [vmem:[#allocation8 + $0x128] ss:$16 sps:$4 sm:$0xff]  }
 0x187   :  { %2524 = vmatprep.subr.bf16.mxu1 %v3400_v58  ;;  %v3473_v58 = vld [vmem:[#allocation8 + $0x228] ss:$16 sps:$4 sm:$0xff]  }
 0x18a   :  { %2525 = vmatpush1.bf16.msra.mxu1 %v3398_v61  ;;  %v3478_v61 = vld [vmem:[#allocation8 + $0x10c] ss:$16 sps:$4 sm:$0xff]  }
 0x18b   :  { %2526 = vmatprep.subr.bf16.mxu1 %v3406_v63  ;;  %v3481_v63 = vld [vmem:[#allocation8 + $0x20c] ss:$16 sps:$4 sm:$0xff]  }
 0x18e   :  { %2527 = vmatpush1.bf16.msra.mxu1 %v3404_v0  ;;  %v3476_v0 = vld [vmem:[#allocation8 + $0x108] ss:$16 sps:$4 sm:$0xff]  }
 0x18f   :  { %2528 = vmatprep.subr.bf16.mxu1 %v3412_v1  ;;  %v3479_v1 = vld [vmem:[#allocation8 + $0x208] ss:$16 sps:$4 sm:$0xff]  }
 0x192   :  { %2529 = vmatpush1.bf16.msra.mxu1 %v3410_v2  ;;  %v3484_v2 = vld [vmem:[#allocation8 + $0x4ec] ss:$16 sps:$4 sm:$0xff]  }
 0x193   :  { %2530 = vmatprep.subr.bf16.mxu1 %v3418_v3  ;;  %v3487_v3 = vld [vmem:[#allocation8 + $0x3ec] ss:$16 sps:$4 sm:$0xff]  }
 0x195   :  { %v3026_v5 = vpop.f32.mrf.mxu0 }
 0x196   :  { %v3048_v6 = vpop.f32.mrf.mxu1  ;;  %2531 = vmatpush1.bf16.msra.mxu1 %v3416_v4  ;;  %v3482_v4 = vld [vmem:[#allocation8 + $0x4e8] ss:$16 sps:$4 sm:$0xff]  }
 0x197   :  { %v3027_v9 = vpop.f32.mrf.mxu0  ;;  %2532 = vmatprep.subr.bf16.mxu1 %v3424_v60  ;;  %v3490_v60 = vld [vmem:[#allocation8 + $0x4cc] ss:$16 sps:$4 sm:$0xff]  }
 0x198   :  { %v3049_v11 = vpop.f32.mrf.mxu1  ;;  %v3028_v14 = vadd.f32 %v3027_v9, %v3026_v5  ;;  %v3493_v5 = vld [vmem:[#allocation8 + $0x3cc] ss:$16 sps:$4 sm:$0xff]  }
 0x199   :  { %v3029_v15 = vpop.f32.mrf.mxu0  ;;  %v3050_v20 = vadd.f32 %v3049_v11, %v3048_v6  ;;  %v3488_v6 = vld [vmem:[#allocation8 + $0x4c8] ss:$16 sps:$4 sm:$0xff]   ;;  %v3499_v9 = vld [vmem:[#allocation8 + $0x3ac] ss:$16 sps:$4 sm:$0xff]  }
 0x19a   :  { %v3051_v17 = vpop.f32.mrf.mxu1  ;;  %v1354_v18 = vadd.f32 %v3028_v14, %v295_v7  ;;  %2533 = vmatpush1.bf16.msra.mxu1 %v3422_v8  ;;  %v3491_v7 = vld [vmem:[#allocation8 + $0x3c8] ss:$16 sps:$4 sm:$0xff]   ;;  %v3496_v8 = vld [vmem:[#allocation8 + $0x4ac] ss:$16 sps:$4 sm:$0xff]  }
 0x19b   :  { %v3030_v22 = vpop.f32.mrf.mxu0  ;;  %2534 = vmatprep.subr.bf16.mxu1 %v3430_v12  ;;  %v3497_v11 = vld [vmem:[#allocation8 + $0x3a8] ss:$16 sps:$4 sm:$0xff]   ;;  %v3502_v12 = vld [vmem:[#allocation8 + $0x48c] ss:$16 sps:$4 sm:$0xff]  }
 0x19c   :  { %v3052_v23 = vpop.f32.mrf.mxu1  ;;  %v1394_v25 = vadd.f32 %v3050_v20, %v1354_v18  ;;  %v3505_v14 = vld [vmem:[#allocation8 + $0x38c] ss:$16 sps:$4 sm:$0xff]   ;;  %v3503_v15 = vld [vmem:[#allocation8 + $0x388] ss:$16 sps:$4 sm:$0xff]  }
 0x19d   :  { %v3511_v17 = vld [vmem:[#allocation8 + $0x36c] ss:$16 sps:$4 sm:$0xff]   ;;  %v3506_v18 = vld [vmem:[#allocation8 + $0x468] ss:$16 sps:$4 sm:$0xff]  }
 0x19e   :  { %v1409_v52 = vmul.f32 %v1394_v25, %v81_v19  ;;  %2535 = vmatpush1.bf16.msra.mxu1 %v3428_v21  ;;  %v3509_v19 = vld [vmem:[#allocation8 + $0x368] ss:$16 sps:$4 sm:$0xff]   ;;  %v3514_v20 = vld [vmem:[#allocation8 + $0x44c] ss:$16 sps:$4 sm:$0xff]  }
 0x19f   :  { %2536 = vmatprep.subr.bf16.mxu1 %v3436_v24  ;;  %v3517_v21 = vld [vmem:[#allocation8 + $0x34c] ss:$16 sps:$4 sm:$0xff]   ;;  %v3512_v22 = vld [vmem:[#allocation8 + $0x448] ss:$16 sps:$4 sm:$0xff]  }
 0x1a0   :  { %v3759_v28 = vpack.c.bf16 %v1409_v52, %v1409_v52  ;;  %v3515_v23 = vld [vmem:[#allocation8 + $0x348] ss:$16 sps:$4 sm:$0xff]   ;;  %v3520_v24 = vld [vmem:[#allocation8 + $0x42c] ss:$16 sps:$4 sm:$0xff]  }
 0x1a1   :  { %v3523_v25 = vld [vmem:[#allocation8 + $0x32c] ss:$16 sps:$4 sm:$0xff]   ;;  %v3518_v52 = vld [vmem:[#allocation8 + $0x428] ss:$16 sps:$4 sm:$0xff]  }
 0x1a2   :  { %2537 = vmatpush2.bf16.msra.mxu1 %v3434_v26  ;;  %2512 = vmatmul.mubr.bf16.vlgmr.msra.gmra.mxu0 %v3759_v28  ;;  %v3521_v26 = vld [vmem:[#allocation8 + $0x328] ss:$16 sps:$4 sm:$0xff]  }
 0x1a3   :  { %2562 = vmatpush1.bf16.msra.mxu0 %v3437_v27  ;;  %2593 = vmatprep.mubr.bf16.mxu0 %v1413_v49  ;;  %v3467_v49 = vld [vmem:[#allocation8 + $0x248] ss:$16 sps:$4 sm:$0xff]   ;;  %v3526_v27 = vld [vmem:[#allocation8 + $0x40c] ss:$16 sps:$4 sm:$0xff]  }
 0x1a4   :  { %2538 = vmatprep.subr.bf16.mxu1 %v3442_v29  ;;  %2563 = vmatprep.subr.bf16.mxu0 %v3445_v32  ;;  %v3529_v29 = vld [vmem:[#allocation8 + $0x30c] ss:$16 sps:$4 sm:$0xff]   ;;  %v3524_v32 = vld [vmem:[#allocation8 + $0x408] ss:$16 sps:$4 sm:$0xff]  }
 0x1a6   :  { %2539 = vmatpush2.bf16.msra.mxu1 %v3440_v33  ;;  %v3527_v33 = vld [vmem:[#allocation8 + $0x308] ss:$16 sps:$4 sm:$0xff]  }
 0x1a7   :  { %2564 = vmatpush1.bf16.msra.mxu0 %v3443_v34  ;;  %2540 = vmatprep.subr.bf16.mxu1 %v3448_v59 }
 0x1a8   :  { %2565 = vmatprep.subr.bf16.mxu0 %v3451_v62 }
 0x1aa   :  { %2541 = vmatpush2.bf16.msra.mxu1 %v3446_v35 }
 0x1ab   :  { %2566 = vmatpush1.bf16.msra.mxu0 %v3449_v36  ;;  %2542 = vmatprep.subr.bf16.mxu1 %v3454_v37  ;;  %v1575_v36 = vld [vmem:[%s3789_s5] sm:$0xf]  ;;  %s3650_s5 = smov [#allocation10]  }
 0x1ac   :  { %2567 = vmatprep.subr.bf16.mxu0 %v3457_v38  ;;  %v1580_v37 = vrot.slane %v1575_v36, %v278_v51  ;;  %v1584_v38 = vrot.slane %v1575_v36, %v282_v53  ;;  %v1588_v53 = vrot.slane %v1575_v36, %v286_v30  ;;  %s2679_s20 = sshll.u32 %s3650_s5, 4  ;;  %s2680_s20 = int_to_ptr.vmem [resolvable:$true] %s2679_s20 }
 0x1ad   :  { %s3612_s21 = scalar_lea.vmem %s2680_s20, 256  ;;  %p3617_p7 = scmp.lt.s32.totalorder %s2680_s20, %s2680_s20 }
 0x1ae   :  { %2543 = vmatpush2.bf16.msra.mxu1 %v3452_v39  ;;  %p3613_p6 = scmp.ne.s32.totalorder %s2680_s20, %s3612_s21  ;;  %p3618_p8 = scmp.lt.s32.totalorder %s3612_s21, %s3612_s21 }
 0x1af   :  { %2568 = vmatpush1.bf16.msra.mxu0 %v3455_v40  ;;  %2544 = vmatprep.subr.bf16.mxu1 %v3460_v41 }
 0x1b0   :  { %2569 = vmatprep.subr.bf16.mxu0 %v3463_v43  ;;  %p3619_p9 = por %p3618_p8, %p3617_p7 }
 0x1b2   :  { %2545 = vmatpush2.bf16.msra.mxu1 %v3458_v44  ;;  %p3620_p10 = pnand %p3619_p9, %p3613_p6 }
 0x1b3   :  { %2570 = vmatpush1.bf16.msra.mxu0 %v3461_v45  ;;  %2546 = vmatprep.subr.bf16.mxu1 %v3466_v46 }
 0x1b4   :  { %2571 = vmatprep.subr.bf16.mxu0 %v3469_v47 }
 0x1b6   :  { %2547 = vmatpush2.bf16.msra.mxu1 %v3464_v48 }
 0x1b7   :  { %2572 = vmatpush1.bf16.msra.mxu0 %v3467_v49  ;;  %2548 = vmatprep.subr.bf16.mxu1 %v3472_v50 }
 0x1b8   :  { %2573 = vmatprep.subr.bf16.mxu0 %v3475_v56 }
 0x1ba   :  { %2549 = vmatpush2.bf16.msra.mxu1 %v3470_v57 }
 0x1bb   :  { %2574 = vmatpush1.bf16.msra.mxu0 %v3473_v58  ;;  %2550 = vmatprep.subr.bf16.mxu1 %v3478_v61 }
 0x1bc   :  { %2575 = vmatprep.subr.bf16.mxu0 %v3481_v63  ;;  %v1592_v63 = vrot.slane %v1575_v36, %v290_v31 }
 0x1be   :  { %2551 = vmatpush2.bf16.msra.mxu1 %v3476_v0 }
 0x1bf   :  { %2576 = vmatpush1.bf16.msra.mxu0 %v3479_v1  ;;  %2602 = vmatprep.subr.bf16.mxu1 %v3484_v2 }
 0x1c0   :  { %2577 = vmatprep.subr.bf16.mxu0 %v3487_v3 }
 0x1c1   :  { %2553 = vmatmul.mubr.bf16.vlgmr.msra.gmra.mxu1 %v3740_v13  ;;  %v3500_v13 = vld [vmem:[#allocation8 + $0x488] ss:$16 sps:$4 sm:$0xff]  }
 0x1c2   :  { %2603 = vmatpush1.bf16.msra.mxu1 %v3482_v4  ;;  %2634 = vmatprep.mubr.bf16.mxu1 %v3649_v16  ;;  %v3508_v16 = vld [vmem:[#allocation8 + $0x46c] ss:$16 sps:$4 sm:$0xff]  }
 0x1c3   :  { %2578 = vmatpush2.bf16.msra.mxu0 %v3485_v54  ;;  %2604 = vmatprep.subr.bf16.mxu1 %v3490_v60 }
 0x1c4   :  { %2579 = vmatprep.subr.bf16.mxu0 %v3493_v5 }
 0x1c6   :  { %2605 = vmatpush1.bf16.msra.mxu1 %v3488_v6 }
 0x1c7   :  { %2580 = vmatpush2.bf16.msra.mxu0 %v3491_v7  ;;  %2606 = vmatprep.subr.bf16.mxu1 %v3496_v8 }
 0x1c8   :  { %2581 = vmatprep.subr.bf16.mxu0 %v3499_v9 }
 0x1ca   :  { %2607 = vmatpush1.bf16.msra.mxu1 %v3494_v10 }
 0x1cb   :  { %2582 = vmatpush2.bf16.msra.mxu0 %v3497_v11  ;;  %2608 = vmatprep.subr.bf16.mxu1 %v3502_v12 }
 0x1cc   :  { %2583 = vmatprep.subr.bf16.mxu0 %v3505_v14 }
 0x1ce   :  { %2609 = vmatpush1.bf16.msra.mxu1 %v3500_v13 }
 0x1cf   :  { %2584 = vmatpush2.bf16.msra.mxu0 %v3503_v15  ;;  %2610 = vmatprep.subr.bf16.mxu1 %v3508_v16 }
 0x1d0   :  { %2585 = vmatprep.subr.bf16.mxu0 %v3511_v17 }
 0x1d2   :  { %2611 = vmatpush1.bf16.msra.mxu1 %v3506_v18 }
 0x1d3   :  { %2586 = vmatpush2.bf16.msra.mxu0 %v3509_v19  ;;  %2612 = vmatprep.subr.bf16.mxu1 %v3514_v20 }
 0x1d4   :  { %2587 = vmatprep.subr.bf16.mxu0 %v3517_v21 }
 0x1d6   :  { %2613 = vmatpush1.bf16.msra.mxu1 %v3512_v22 }
 0x1d7   :  { %2588 = vmatpush2.bf16.msra.mxu0 %v3515_v23  ;;  %2614 = vmatprep.subr.bf16.mxu1 %v3520_v24 }
 0x1d8   :  { %2589 = vmatprep.subr.bf16.mxu0 %v3523_v25 }
 0x1da   :  { %2615 = vmatpush1.bf16.msra.mxu1 %v3518_v52 }
 0x1db   :  { %2590 = vmatpush2.bf16.msra.mxu0 %v3521_v26  ;;  %2616 = vmatprep.subr.bf16.mxu1 %v3526_v27 }
 0x1dc   :  { %2591 = vmatprep.subr.bf16.mxu0 %v3529_v29 }
 0x1de   :  { %2617 = vmatpush1.bf16.msra.mxu1 %v3524_v32 }
 0x1df   :  { %2592 = vmatpush2.bf16.msra.mxu0 %v3527_v33 }
 0x1e1   :  { %2635 = vmatmul.mubr.bf16.vlgmr.msra.gmra.mxu1 %v3759_v28 }
 0x1e2   :  { %2594 = vmatmul.mubr.bf16.vlgmr.msra.gmra.mxu0 %v3753_v55 }
 0x201   :  { %v2431_v34 = vpop.f32.mrf.mxu0 }
 0x202   :  { %v2432_v39 = vadd.f32 %v2431_v34, %v1580_v37 }
 0x203   :  { %v2433_v59 = vpop.f32.mrf.mxu0 }
 0x204   :  { %v2434_v41 = vadd.f32 %v2433_v59, %v1584_v38 }
 0x205   :  { %v2435_v62 = vpop.f32.mrf.mxu0 }
 0x207   :  { %v2436_v35 = vpop.f32.mrf.mxu0 }
 0x241   :  { %v2472_v40 = vpop.f32.mrf.mxu1 }
 0x242   :  { %v2473_v28 = vadd.f32 %v2472_v40, %v2432_v39 }
 0x243   :  { %v2474_v43 = vpop.f32.mrf.mxu1 }
 0x244   :  { %v2475_v55 = vadd.f32 %v2474_v43, %v2434_v41 }
 0x245   :  { %v2476_v44 = vpop.f32.mrf.mxu1 }
 0x247   :  { %v2477_v45 = vpop.f32.mrf.mxu1 }
 0x262   :  { %v2513_v46 = vpop.f32.mrf.mxu0 }
 0x263   :  { %v2514_v47 = vadd.f32 %v2513_v46, %v2473_v28 }
 0x264   :  { %v2515_v48 = vpop.f32.mrf.mxu0 }
 0x265   :  { %v2516_v61 = vadd.f32 %v2515_v48, %v2475_v55  ;;  %v2643_v4 = vmul.f32 %v2514_v47, %v2514_v47 }
 0x266   :  { %v2517_v49 = vpop.f32.mrf.mxu0 }
 0x267   :  { %v2644_v0 = vmul.f32 %v2516_v61, %v2516_v61  ;;  %v2648_v30 = vsel %vm2647_vm0, %v2643_v4, 0.0 }
 0x268   :  { %v2518_v50 = vpop.f32.mrf.mxu0 }
 0x269   :  { %v2649_v7 = vsel %vm2647_vm0, %v2644_v0, 0.0 }
 0x26a   :  { %v2650_v13 = vadd.f32 %v2649_v7, %v2648_v30 }
 0x281   :  { %v2554_v56 = vpop.f32.mrf.mxu1 }
 0x282   :  { %v2555_v1 = vadd.f32 %v2554_v56, %v1588_v53 }
 0x283   :  { %v2556_v57 = vpop.f32.mrf.mxu1 }
 0x284   :  { %v2557_v54 = vadd.f32 %v2556_v57, %v1592_v63 }
 0x285   :  { %v2558_v58 = vpop.f32.mrf.mxu1 }
 0x287   :  { %v2559_v51 = vpop.f32.mrf.mxu1 }
 0x2a1   :  { %v2636_v2 = vpop.f32.mrf.mxu1 }
 0x2a2   :  { %v2595_v3 = vpop.f32.mrf.mxu0 }
 0x2a3   :  { %v2596_v60 = vadd.f32 %v2595_v3, %v2555_v1  ;;  %v2638_v5 = vpop.f32.mrf.mxu1 }
 0x2a4   :  { %v2597_v6 = vpop.f32.mrf.mxu0 }
 0x2a5   :  { %v2637_v8 = vadd.f32 %v2636_v2, %v2596_v60  ;;  %v2598_v9 = vadd.f32 %v2597_v6, %v2557_v54  ;;  %v2640_v10 = vpop.f32.mrf.mxu1 }
 0x2a6   :  { %v2599_v11 = vpop.f32.mrf.mxu0 }
 0x2a7   :  { %v2645_v42 = vmul.f32 %v2637_v8, %v2637_v8  ;;  %v2639_v31 = vadd.f32 %v2638_v5, %v2598_v9  ;;  %v2641_v12 = vpop.f32.mrf.mxu1 }
 0x2a8   :  { %v2600_v14 = vpop.f32.mrf.mxu0 }
 0x2a9   :  { %v2646_v15 = vmul.f32 %v2639_v31, %v2639_v31  ;;  %v2651_v16 = vsel %vm2647_vm0, %v2645_v42, 0.0 }
 0x2aa   :  { %v2652_v17 = vadd.f32 %v2651_v16, %v2650_v13 }
 0x2ab   :  { %v2653_v18 = vsel %vm2647_vm0, %v2646_v15, 0.0 }
 0x2ac   :  { %v2654_v19 = vadd.f32 %v2653_v18, %v2652_v17 }
 0x2ae   :  { %2655 = vadd.xlane.f32.xlu0 %v2654_v19 }
 0x337   :  { %v2656_v20 = vpop.xlane.xlu0 %2655 }
 0x338   :  { %v2657_v21 = vadd.f32 1e-12, %v2656_v20 }
 0x33a   :  { %3530 = vrsqrt.f32 %v2657_v21 }
 0x347   :  { %v3531_v22 = vpop.eup %3530 }
 0x348   :  { %v2659_v23 = vmul.f32 %v3531_v22, %v2514_v47  ;;  %v2660_v24 = vmul.f32 %v3531_v22, %v2516_v61  ;;  %v2661_v25 = vmul.f32 %v3531_v22, %v2637_v8  ;;  %v2662_v52 = vmul.f32 %v3531_v22, %v2639_v31 }
 0x34a   :  { %v2667_v26 = vcombine.low %v2659_v23, %v2660_v24  ;;  %v2668_v27 = vcombine.low %v2661_v25, %v2662_v52 }
 0x34c   :  { %2671 = vst [vmem:[#allocation10] sm:$0xff] %v2667_v26  ;;  %2672 = vst [vmem:[#allocation10 + $0x8] sm:$0xff] %v2668_v27 }
 0x34d   :  { %3623 = shalt.err (!%p3620_p10)
}
 0x34e   :  { %2682 = dma.vmem_to_hbm [thread:$0]  %s2680_s20, 256, %s3790_s6, [#allocation4]  }
 0x34f   :  { %3638 = dma.done.wait [#allocation4], 256  }
 0x350   :  { %3639 = vsyncadd [#allocation4], 4294967040 }
 0x351   :  { %2686 = vsyncpa [#allocation3], 1 }
 0x352   :  { %2687 = vsyncpa [#allocation6], 1 }
 0x353   :  { %2688 = vsyncpa [#allocation9], 1 }
 0x354   :  { %2689 = vsyncpa [#allocation4], 1 }

</bundles_post_ra>
